<compile_context>
chip_gen: v6e
topology: v6e:2x2x1
jax: 0.10.0
libtpu: 0.0.40
codegen_flags: <defaults>
</compile_context>

<pallas_src>
import functools

import jax
import jax.numpy as jnp
from jax.experimental import pallas as pl
from jax.experimental.pallas import tpu as pltpu


NUM_OUT_LANES = 128   # packed scalar output width (lane-dense store)


# ----------------------------------------------------------------------------
# Single fused kernel: stylenet (typenet stand-in) + TextBranch + all losses.
# ----------------------------------------------------------------------------
def make_triple_kernel(batch, margin):
    B = int(batch)          # B a multiple of 8 keeps every sublane slice aligned
    m = float(margin)
    eps_sq = 1e-20          # ~(1e-10)^2: matches "norm + 1e-10" up to tiny diff
    bn_eps = 1e-3           # nn.BatchNorm1d(..., eps=0.001)
    pd_eps = 1e-6           # F.pairwise_distance default eps (d = a - b + eps)

    def kernel(img_ref, wimg_ref, bimg_ref, mask_ref,
               txt_ref, w1_ref, b1_ref, gamma_ref, beta_ref, w2_ref, b2_ref,
               ht_ref, out_ref):
        f32 = jnp.float32

        # ---------- stylenet (typenet) stand-in: one 3B-row MXU matmul -------
        feats = jnp.dot(img_ref[...], wimg_ref[...],
                        preferred_element_type=f32) + bimg_ref[...]     # (3B,E)
        msk = mask_ref[...]                                              # (B,E)
        msk3 = jnp.concatenate([msk, msk, msk], axis=0)                  # (3B,E)
        ep_all = feats * msk3                                            # masked

        # ---------- TextBranch: Linear -> BN(train, per-branch) -> ReLU ------
        h = jnp.dot(txt_ref[...], w1_ref[...],
                    preferred_element_type=f32) + b1_ref[...]            # (3B,E)
        h3 = h.reshape(3, B, -1)                                         # (3,B,E)
        mu = jnp.mean(h3, axis=1, keepdims=True)                         # (3,1,E)
        musq = jnp.mean(h3 * h3, axis=1, keepdims=True)
        var = jnp.maximum(musq - mu * mu, 0.0)
        hn = (h3 - mu) * jax.lax.rsqrt(var + bn_eps) * gamma_ref[...] \
            + beta_ref[...]
        hr = jnp.maximum(hn, 0.0).reshape(3 * B, -1)                     # (3B,E)
        o = jnp.dot(hr.astype(jnp.bfloat16), w2_ref[...],
                    preferred_element_type=f32) + b2_ref[...]            # (3B,E)

        # ---------- fused row-norm reductions (one cross-lane reduce) --------
        sq_stack = jnp.concatenate(
            [feats * feats, ep_all * ep_all, jnp.abs(msk)], axis=0)      # (7B,E)
        row_red = jnp.sum(sq_stack, axis=1, keepdims=True)               # (7B,1)
        ess = row_red[3 * B:6 * B]          # per-row ||f*mask||^2       (3B,1)
        mrow = row_red[6 * B:7 * B]         # per-row L1 of mask          (B,1)

        inv = jax.lax.rsqrt(row_red[0:6 * B] + eps_sq)   # one EUP push
        gen_all = feats * inv[0:3 * B]                   # general_{x,y,z}
        emb_all = ep_all * inv[3 * B:6 * B]              # embedding_{x,y,z}

        oss = jnp.sum(o * o, axis=1, keepdims=True)                      # (3B,1)
        t_all = o * jax.lax.rsqrt(oss + eps_sq)          # text embeddings

        gx, gy, gz = gen_all[0:B], gen_all[B:2 * B], gen_all[2 * B:3 * B]
        ex, ey, ez = emb_all[0:B], emb_all[B:2 * B], emb_all[2 * B:3 * B]
        tx, ty, tz = t_all[0:B], t_all[B:2 * B], t_all[2 * B:3 * B]

        ht = ht_ref[...]                                                 # (3B,1)
        hx, hy, hz = ht[0:B], ht[B:2 * B], ht[2 * B:3 * B]
        hprod = hx * hy * hz

        # ---------- all 17 pairwise distances: one reduce + one sqrt ---------
        dstack = jnp.concatenate(
            [ex - ey, ex - ez,                       # 0,1     comp / acc
             gy - gz, gx - gy, gx - gz,              # 2,3,4   sim_img
             tz - ty, tx - ty, tx - tz,              # 5,6,7   sim_text
             gx - tx, gy - tx, gz - tx,              # 8,9,10  vse_x
             gy - ty, gx - ty, gz - ty,              # 11,12,13 vse_y
             gz - tz, gy - tz, gx - tz],             # 14,15,16 vse_z
            axis=0) + pd_eps                                             # (17B,E)
        d2 = jnp.sum(dstack * dstack, axis=1, keepdims=True)             # (17B,1)
        dist = jnp.sqrt(d2)                              # one EUP push

        def d(i):
            return dist[i * B:(i + 1) * B]

        dist_pos, dist_neg = d(0), d(1)
        dcat_p, dcat_n1, dcat_n2 = d(2), d(3), d(4)
        pos_t, neg_t1, neg_t2 = d(5), d(6), d(7)

        def hinge(x1, x2):
            # MarginRankingLoss(margin), target=+1, per-row term.
            return jnp.maximum(0.0, -(x1 - x2) + m)

        def mrank(pos, neg, has):
            # modifiedRankingLoss per-row term (normalized after the reduce).
            return jnp.clip(pos - neg + m, 0.0, 1.0e6) * has

        diff = dist_neg - dist_pos
        cols = [
            (diff > 0.0).astype(f32),            # 0  acc indicator
            hinge(dist_neg, dist_pos),           # 1  compatibility hinge
            hinge(dcat_p, dcat_n1),              # 2  sim_img 1
            hinge(dcat_p, dcat_n2),              # 3  sim_img 2
            mrank(pos_t, neg_t1, hprod),         # 4  sim_text 1
            mrank(pos_t, neg_t2, hprod),         # 5  sim_text 2
            mrank(d(8), d(9), hx),               # 6  vse_x 1
            mrank(d(8), d(10), hx),              # 7  vse_x 2
            mrank(d(11), d(12), hy),             # 8  vse_y 1
            mrank(d(11), d(13), hy),             # 9  vse_y 2
            mrank(d(14), d(15), hz),             # 10 vse_z 1
            mrank(d(14), d(16), hz),             # 11 vse_z 2
            hprod, hx, hy, hz,                   # 12..15 has_text totals
            ess[0:B], ess[B:2 * B], ess[2 * B:3 * B],   # 16..18 embed norms^2
            mrow,                                # 19 mask L1 row sums
        ]
        stack = jnp.concatenate(cols, axis=1)                            # (B,20)
        S = jnp.sum(stack, axis=0, keepdims=True)   # single sublane reduce (1,20)

        def s(i):
            return S[:, i:i + 1]

        inv_b = 1.0 / B
        acc = s(0) * inv_b
        comp_loss = s(1) * inv_b
        sim_img = (s(2) + s(3)) * (0.5 * inv_b)
        sim_txt = (s(4) + s(5)) / (2.0 * jnp.maximum(s(12), 1.0))
        vse_x = (s(6) + s(7)) / (2.0 * jnp.maximum(s(13), 1.0))
        vse_y = (s(8) + s(9)) / (2.0 * jnp.maximum(s(14), 1.0))
        vse_z = (s(10) + s(11)) / (2.0 * jnp.maximum(s(15), 1.0))
        vse_loss = (vse_x + vse_y + vse_z) / 3.0

        branch_norm = jnp.sqrt(S[:, 16:19])                              # (1,3)
        embed_norm = (branch_norm[:, 0:1] + branch_norm[:, 1:2]
                      + branch_norm[:, 2:3]) / 3.0
        mask_loss = s(19) * inv_b              # identical mask for x/y/z
        embed_loss = embed_norm * (B ** -0.5)

        # ---------- pack 7 scalars into one lane-dense (1,128) store ---------
        out_ref[...] = jnp.concatenate(
            [acc, comp_loss, sim_img, sim_txt, vse_loss, mask_loss, embed_loss,
             jnp.zeros((1, NUM_OUT_LANES - 7), f32)], axis=1)

    return kernel


def run_triple_network_kernel(margin, batch, img_all, w_img, b_img, mask,
                              txt_all, w1, b1, gamma, beta, w2, b2, ht_all):
    vmem = pl.BlockSpec(memory_space=pltpu.MemorySpace.VMEM)
    return pl.pallas_call(
        make_triple_kernel(batch, margin),
        out_shape=jax.ShapeDtypeStruct((1, NUM_OUT_LANES), jnp.float32),
        in_specs=[vmem] * 12,
        out_specs=vmem,
        compiler_params=pltpu.CompilerParams(
            vmem_limit_bytes=32 * 1024 * 1024),
    )(img_all, w_img, b_img, mask, txt_all, w1, b1, gamma, beta, w2, b2, ht_all)


# ----------------------------------------------------------------------------
# TripleNetwork.forward wrapper (glue in plain JAX).
# ----------------------------------------------------------------------------
@functools.partial(jax.jit, static_argnames=("margin",))
def triple_network_forward(params, imgs_x, imgs_y, imgs_z, condition,
                           text_x, text_y, text_z, ht_x, ht_y, ht_z, margin):
    B = imgs_x.shape[0]
    # Batch x/y/z along the batch axis -> one kernel launch, 3B-row matmuls.
    # bf16 casts feed the MXU and halve activation DMA bytes.
    # TODO(synk): at real image sizes, replace this host-side concatenate with
    # a size-3 grid axis + index_map so the three tensors are DMA'd in place.
    img_all = jnp.concatenate(
        [imgs_x.reshape(B, -1), imgs_y.reshape(B, -1), imgs_z.reshape(B, -1)],
        axis=0).astype(jnp.bfloat16)
    txt_all = jnp.concatenate([text_x, text_y, text_z],
                              axis=0).astype(jnp.bfloat16)
    ht_all = jnp.concatenate([ht_x, ht_y, ht_z], axis=0).astype(jnp.float32)
    gathered_mask = params["masks"][condition]        # (B, E) gather (XLA glue)

    packed = run_triple_network_kernel(
        margin, B, img_all, params["w_img"], params["b_img"], gathered_mask,
        txt_all, params["w1"], params["b1"], params["gamma"], params["beta"],
        params["w2"], params["b2"], ht_all)

    # (acc, compatibility_loss, sim_loss_image, sim_text_loss, vse_loss,
    #  mask_loss, embed_loss)
    return tuple(packed[0, i] for i in range(7))


# ----------------------------------------------------------------------------
if __name__ == "__main__":
    B, C, H, W = 8, 4, 16, 16    # B multiple of 8 -> aligned sublane slices
    TEXT_DIM = 128               # lane-dense (last dim = 128)
    EMB_DIM = 128                # lane-dense (last dim = 128)
    N_COND = 4
    MARGIN = 0.2

    key = jax.random.PRNGKey(0)
    ks = jax.random.split(key, 16)

    # Deterministic synthetic parameters (MXU operands stored in bf16).
    params = {
        # stylenet stand-in
        "w_img": (0.05 * jax.random.normal(ks[0], (C * H * W, EMB_DIM),
                                           jnp.float32)).astype(jnp.bfloat16),
        "b_img": 0.01 * jax.random.normal(ks[1], (1, EMB_DIM), jnp.float32),
        "masks": jax.random.normal(ks[2], (N_COND, EMB_DIM), jnp.float32),
        # TextBranch
        "w1": (0.1 * jax.random.normal(ks[3], (TEXT_DIM, EMB_DIM),
                                       jnp.float32)).astype(jnp.bfloat16),
        "b1": 0.01 * jax.random.normal(ks[4], (1, EMB_DIM), jnp.float32),
        "gamma": jnp.ones((1, EMB_DIM), jnp.float32),   # BatchNorm1d defaults
        "beta": jnp.zeros((1, EMB_DIM), jnp.float32),
        "w2": (0.1 * jax.random.normal(ks[5], (EMB_DIM, EMB_DIM),
                                       jnp.float32)).astype(jnp.bfloat16),
        "b2": 0.01 * jax.random.normal(ks[6], (1, EMB_DIM), jnp.float32),
    }

    # Inputs (x, y, z each carry .images, .text, .has_text; x also .condition).
    imgs_x = jax.random.normal(ks[7], (B, C, H, W), jnp.float32)
    imgs_y = jax.random.normal(ks[8], (B, C, H, W), jnp.float32)
    imgs_z = jax.random.normal(ks[9], (B, C, H, W), jnp.float32)
    condition = jax.random.randint(ks[10], (B,), 0, N_COND)
    text_x = jax.random.normal(ks[11], (B, TEXT_DIM), jnp.float32)
    text_y = jax.random.normal(ks[12], (B, TEXT_DIM), jnp.float32)
    text_z = jax.random.normal(ks[13], (B, TEXT_DIM), jnp.float32)
    ht_x = jax.random.bernoulli(ks[14], 0.8, (B, 1)).astype(jnp.float32)
    ht_y = jax.random.bernoulli(ks[15], 0.8, (B, 1)).astype(jnp.float32)
    ht_z = jnp.ones((B, 1), jnp.float32)

    outs = triple_network_forward(params, imgs_x, imgs_y, imgs_z, condition,
                                  text_x, text_y, text_z, ht_x, ht_y, ht_z,
                                  margin=MARGIN)
    outs = jax.block_until_ready(outs)
    names = ("acc", "compatibility_loss", "sim_loss_image", "sim_text_loss",
             "vse_loss", "mask_loss", "embed_loss")
    for n, v in zip(names, outs):
        assert jnp.isfinite(v), f"non-finite output: {n}"
    print("KERNEL_OK")
</pallas_src>

<mosaic_0001>
module attributes {stable_mosaic.version = 11 : i64} {
  func.func @kernel(%arg0: memref<24x1024xbf16, #tpu.memory_space<vmem>>, %arg1: memref<1024x128xbf16, #tpu.memory_space<vmem>>, %arg2: memref<1x128xf32, #tpu.memory_space<vmem>>, %arg3: memref<8x128xf32, #tpu.memory_space<vmem>>, %arg4: memref<24x128xbf16, #tpu.memory_space<vmem>>, %arg5: memref<128x128xbf16, #tpu.memory_space<vmem>>, %arg6: memref<1x128xf32, #tpu.memory_space<vmem>>, %arg7: memref<1x128xf32, #tpu.memory_space<vmem>>, %arg8: memref<1x128xf32, #tpu.memory_space<vmem>>, %arg9: memref<128x128xbf16, #tpu.memory_space<vmem>>, %arg10: memref<1x128xf32, #tpu.memory_space<vmem>>, %arg11: memref<24x1xf32, #tpu.memory_space<vmem>>, %arg12: memref<1x128xf32, #tpu.memory_space<vmem>>) attributes {dimension_semantics = [], scalar_prefetch = 0 : i64, scratch_operands = 0 : i64, tpu.core_type = #tpu.core_type<tc>} {
    %c0 = arith.constant 0 : index
    %c0_0 = arith.constant 0 : index
    %0 = vector.load %arg0[%c0, %c0_0] : memref<24x1024xbf16, #tpu.memory_space<vmem>>, vector<24x1024xbf16>
    %c0_1 = arith.constant 0 : index
    %c0_2 = arith.constant 0 : index
    %1 = vector.load %arg1[%c0_1, %c0_2] : memref<1024x128xbf16, #tpu.memory_space<vmem>>, vector<1024x128xbf16>
    %cst = arith.constant dense<0.000000e+00> : vector<24x128xf32>
    %2 = tpu.matmul %0, %1, %cst {dimension_numbers = #tpu.dot_dimension_numbers<[1], [0], [0], [1], [0, 0, 1, 1], [], []>} : vector<24x1024xbf16>, vector<1024x128xbf16>, vector<24x128xf32> -> vector<24x128xf32>
    %c0_3 = arith.constant 0 : index
    %c0_4 = arith.constant 0 : index
    %3 = vector.load %arg2[%c0_3, %c0_4] : memref<1x128xf32, #tpu.memory_space<vmem>>, vector<1x128xf32>
    %4 = vector.broadcast %3 : vector<1x128xf32> to vector<24x128xf32>
    %5 = arith.addf %2, %4 : vector<24x128xf32>
    %c0_5 = arith.constant 0 : index
    %c0_6 = arith.constant 0 : index
    %6 = vector.load %arg3[%c0_5, %c0_6] : memref<8x128xf32, #tpu.memory_space<vmem>>, vector<8x128xf32>
    %7 = tpu.concatenate %6, %6, %6 in 0 : vector<8x128xf32>, vector<8x128xf32>, vector<8x128xf32> -> vector<24x128xf32>
    %8 = arith.mulf %5, %7 : vector<24x128xf32>
    %c0_7 = arith.constant 0 : index
    %c0_8 = arith.constant 0 : index
    %9 = vector.load %arg4[%c0_7, %c0_8] : memref<24x128xbf16, #tpu.memory_space<vmem>>, vector<24x128xbf16>
    %c0_9 = arith.constant 0 : index
    %c0_10 = arith.constant 0 : index
    %10 = vector.load %arg5[%c0_9, %c0_10] : memref<128x128xbf16, #tpu.memory_space<vmem>>, vector<128x128xbf16>
    %cst_11 = arith.constant dense<0.000000e+00> : vector<24x128xf32>
    %11 = tpu.matmul %9, %10, %cst_11 {dimension_numbers = #tpu.dot_dimension_numbers<[1], [0], [0], [1], [0, 0, 1, 1], [], []>} : vector<24x128xbf16>, vector<128x128xbf16>, vector<24x128xf32> -> vector<24x128xf32>
    %c0_12 = arith.constant 0 : index
    %c0_13 = arith.constant 0 : index
    %12 = vector.load %arg6[%c0_12, %c0_13] : memref<1x128xf32, #tpu.memory_space<vmem>>, vector<1x128xf32>
    %13 = vector.broadcast %12 : vector<1x128xf32> to vector<24x128xf32>
    %14 = arith.addf %11, %13 : vector<24x128xf32>
    %15 = vector.shape_cast %14 : vector<24x128xf32> to vector<3x8x128xf32>
    %cst_14 = arith.constant dense<0.000000e+00> : vector<3x128xf32>
    %16 = vector.multi_reduction <add>, %15, %cst_14 [1] : vector<3x8x128xf32> to vector<3x128xf32>
    %17 = vector.shape_cast %16 : vector<3x128xf32> to vector<3x1x128xf32>
    %cst_15 = arith.constant 8.000000e+00 : f32
    %18 = vector.broadcast %cst_15 : f32 to vector<3x1x128xf32>
    %19 = arith.divf %17, %18 : vector<3x1x128xf32>
    %20 = arith.mulf %15, %15 : vector<3x8x128xf32>
    %cst_16 = arith.constant dense<0.000000e+00> : vector<3x128xf32>
    %21 = vector.multi_reduction <add>, %20, %cst_16 [1] : vector<3x8x128xf32> to vector<3x128xf32>
    %22 = vector.shape_cast %21 : vector<3x128xf32> to vector<3x1x128xf32>
    %cst_17 = arith.constant 8.000000e+00 : f32
    %23 = vector.broadcast %cst_17 : f32 to vector<3x1x128xf32>
    %24 = arith.divf %22, %23 : vector<3x1x128xf32>
    %25 = arith.mulf %19, %19 : vector<3x1x128xf32>
    %26 = arith.subf %24, %25 : vector<3x1x128xf32>
    %cst_18 = arith.constant 0.000000e+00 : f32
    %27 = vector.broadcast %cst_18 : f32 to vector<3x1x128xf32>
    %28 = arith.maximumf %26, %27 : vector<3x1x128xf32>
    %29 = vector.broadcast %19 : vector<3x1x128xf32> to vector<3x8x128xf32>
    %30 = arith.subf %15, %29 : vector<3x8x128xf32>
    %cst_19 = arith.constant 1.000000e-03 : f32
    %31 = vector.broadcast %cst_19 : f32 to vector<3x1x128xf32>
    %32 = arith.addf %28, %31 : vector<3x1x128xf32>
    %33 = math.rsqrt %32 : vector<3x1x128xf32>
    %34 = vector.broadcast %33 : vector<3x1x128xf32> to vector<3x8x128xf32>
    %35 = arith.mulf %30, %34 : vector<3x8x128xf32>
    %c0_20 = arith.constant 0 : index
    %c0_21 = arith.constant 0 : index
    %36 = vector.load %arg7[%c0_20, %c0_21] : memref<1x128xf32, #tpu.memory_space<vmem>>, vector<1x128xf32>
    %37 = vector.shape_cast %36 : vector<1x128xf32> to vector<1x1x128xf32>
    %38 = vector.broadcast %37 : vector<1x1x128xf32> to vector<3x8x128xf32>
    %39 = arith.mulf %35, %38 : vector<3x8x128xf32>
    %c0_22 = arith.constant 0 : index
    %c0_23 = arith.constant 0 : index
    %40 = vector.load %arg8[%c0_22, %c0_23] : memref<1x128xf32, #tpu.memory_space<vmem>>, vector<1x128xf32>
    %41 = vector.shape_cast %40 : vector<1x128xf32> to vector<1x1x128xf32>
    %42 = vector.broadcast %41 : vector<1x1x128xf32> to vector<3x8x128xf32>
    %43 = arith.addf %39, %42 : vector<3x8x128xf32>
    %cst_24 = arith.constant 0.000000e+00 : f32
    %44 = vector.broadcast %cst_24 : f32 to vector<3x8x128xf32>
    %45 = arith.maximumf %43, %44 : vector<3x8x128xf32>
    %46 = vector.shape_cast %45 : vector<3x8x128xf32> to vector<24x128xf32>
    %47 = arith.truncf %46 : vector<24x128xf32> to vector<24x128xbf16>
    %c0_25 = arith.constant 0 : index
    %c0_26 = arith.constant 0 : index
    %48 = vector.load %arg9[%c0_25, %c0_26] : memref<128x128xbf16, #tpu.memory_space<vmem>>, vector<128x128xbf16>
    %cst_27 = arith.constant dense<0.000000e+00> : vector<24x128xf32>
    %49 = tpu.matmul %47, %48, %cst_27 {dimension_numbers = #tpu.dot_dimension_numbers<[1], [0], [0], [1], [0, 0, 1, 1], [], []>} : vector<24x128xbf16>, vector<128x128xbf16>, vector<24x128xf32> -> vector<24x128xf32>
    %c0_28 = arith.constant 0 : index
    %c0_29 = arith.constant 0 : index
    %50 = vector.load %arg10[%c0_28, %c0_29] : memref<1x128xf32, #tpu.memory_space<vmem>>, vector<1x128xf32>
    %51 = vector.broadcast %50 : vector<1x128xf32> to vector<24x128xf32>
    %52 = arith.addf %49, %51 : vector<24x128xf32>
    %53 = arith.mulf %5, %5 : vector<24x128xf32>
    %54 = arith.mulf %8, %8 : vector<24x128xf32>
    %55 = math.absf %6 : vector<8x128xf32>
    %56 = tpu.concatenate %53, %54, %55 in 0 : vector<24x128xf32>, vector<24x128xf32>, vector<8x128xf32> -> vector<56x128xf32>
    %cst_30 = arith.constant dense<0.000000e+00> : vector<56xf32>
    %57 = vector.multi_reduction <add>, %56, %cst_30 [1] : vector<56x128xf32> to vector<56xf32>
    %58 = vector.shape_cast %57 : vector<56xf32> to vector<56x1xf32>
    %59 = vector.extract_strided_slice %58 {offsets = [24, 0], sizes = [24, 1], strides = [1, 1]} : vector<56x1xf32> to vector<24x1xf32>
    %60 = vector.extract_strided_slice %58 {offsets = [48, 0], sizes = [8, 1], strides = [1, 1]} : vector<56x1xf32> to vector<8x1xf32>
    %61 = vector.extract_strided_slice %58 {offsets = [0, 0], sizes = [48, 1], strides = [1, 1]} : vector<56x1xf32> to vector<48x1xf32>
    %cst_31 = arith.constant 9.99999968E-21 : f32
    %62 = vector.broadcast %cst_31 : f32 to vector<48x1xf32>
    %63 = arith.addf %61, %62 : vector<48x1xf32>
    %64 = math.rsqrt %63 : vector<48x1xf32>
    %65 = vector.extract_strided_slice %64 {offsets = [0, 0], sizes = [24, 1], strides = [1, 1]} : vector<48x1xf32> to vector<24x1xf32>
    %66 = vector.broadcast %65 : vector<24x1xf32> to vector<24x128xf32>
    %67 = arith.mulf %5, %66 : vector<24x128xf32>
    %68 = vector.extract_strided_slice %64 {offsets = [24, 0], sizes = [24, 1], strides = [1, 1]} : vector<48x1xf32> to vector<24x1xf32>
    %69 = vector.broadcast %68 : vector<24x1xf32> to vector<24x128xf32>
    %70 = arith.mulf %8, %69 : vector<24x128xf32>
    %71 = arith.mulf %52, %52 : vector<24x128xf32>
    %cst_32 = arith.constant dense<0.000000e+00> : vector<24xf32>
    %72 = vector.multi_reduction <add>, %71, %cst_32 [1] : vector<24x128xf32> to vector<24xf32>
    %73 = vector.shape_cast %72 : vector<24xf32> to vector<24x1xf32>
    %cst_33 = arith.constant 9.99999968E-21 : f32
    %74 = vector.broadcast %cst_33 : f32 to vector<24x1xf32>
    %75 = arith.addf %73, %74 : vector<24x1xf32>
    %76 = math.rsqrt %75 : vector<24x1xf32>
    %77 = vector.broadcast %76 : vector<24x1xf32> to vector<24x128xf32>
    %78 = arith.mulf %52, %77 : vector<24x128xf32>
    %79 = vector.extract_strided_slice %67 {offsets = [0, 0], sizes = [8, 128], strides = [1, 1]} : vector<24x128xf32> to vector<8x128xf32>
    %80 = vector.extract_strided_slice %67 {offsets = [8, 0], sizes = [8, 128], strides = [1, 1]} : vector<24x128xf32> to vector<8x128xf32>
    %81 = vector.extract_strided_slice %67 {offsets = [16, 0], sizes = [8, 128], strides = [1, 1]} : vector<24x128xf32> to vector<8x128xf32>
    %82 = vector.extract_strided_slice %70 {offsets = [0, 0], sizes = [8, 128], strides = [1, 1]} : vector<24x128xf32> to vector<8x128xf32>
    %83 = vector.extract_strided_slice %70 {offsets = [8, 0], sizes = [8, 128], strides = [1, 1]} : vector<24x128xf32> to vector<8x128xf32>
    %84 = vector.extract_strided_slice %70 {offsets = [16, 0], sizes = [8, 128], strides = [1, 1]} : vector<24x128xf32> to vector<8x128xf32>
    %85 = vector.extract_strided_slice %78 {offsets = [0, 0], sizes = [8, 128], strides = [1, 1]} : vector<24x128xf32> to vector<8x128xf32>
    %86 = vector.extract_strided_slice %78 {offsets = [8, 0], sizes = [8, 128], strides = [1, 1]} : vector<24x128xf32> to vector<8x128xf32>
    %87 = vector.extract_strided_slice %78 {offsets = [16, 0], sizes = [8, 128], strides = [1, 1]} : vector<24x128xf32> to vector<8x128xf32>
    %c0_34 = arith.constant 0 : index
    %c0_35 = arith.constant 0 : index
    %88 = vector.load %arg11[%c0_34, %c0_35] : memref<24x1xf32, #tpu.memory_space<vmem>>, vector<24x1xf32>
    %89 = vector.extract_strided_slice %88 {offsets = [0, 0], sizes = [8, 1], strides = [1, 1]} : vector<24x1xf32> to vector<8x1xf32>
    %90 = vector.extract_strided_slice %88 {offsets = [8, 0], sizes = [8, 1], strides = [1, 1]} : vector<24x1xf32> to vector<8x1xf32>
    %91 = vector.extract_strided_slice %88 {offsets = [16, 0], sizes = [8, 1], strides = [1, 1]} : vector<24x1xf32> to vector<8x1xf32>
    %92 = arith.mulf %89, %90 : vector<8x1xf32>
    %93 = arith.mulf %92, %91 : vector<8x1xf32>
    %94 = arith.subf %82, %83 : vector<8x128xf32>
    %95 = arith.subf %82, %84 : vector<8x128xf32>
    %96 = arith.subf %80, %81 : vector<8x128xf32>
    %97 = arith.subf %79, %80 : vector<8x128xf32>
    %98 = arith.subf %79, %81 : vector<8x128xf32>
    %99 = arith.subf %87, %86 : vector<8x128xf32>
    %100 = arith.subf %85, %86 : vector<8x128xf32>
    %101 = arith.subf %85, %87 : vector<8x128xf32>
    %102 = arith.subf %79, %85 : vector<8x128xf32>
    %103 = arith.subf %80, %85 : vector<8x128xf32>
    %104 = arith.subf %81, %85 : vector<8x128xf32>
    %105 = arith.subf %80, %86 : vector<8x128xf32>
    %106 = arith.subf %79, %86 : vector<8x128xf32>
    %107 = arith.subf %81, %86 : vector<8x128xf32>
    %108 = arith.subf %81, %87 : vector<8x128xf32>
    %109 = arith.subf %80, %87 : vector<8x128xf32>
    %110 = arith.subf %79, %87 : vector<8x128xf32>
    %111 = tpu.concatenate %94, %95, %96, %97, %98, %99, %100, %101, %102, %103, %104, %105, %106, %107, %108, %109 in 0 : vector<8x128xf32>, vector<8x128xf32>, vector<8x128xf32>, vector<8x128xf32>, vector<8x128xf32>, vector<8x128xf32>, vector<8x128xf32>, vector<8x128xf32>, vector<8x128xf32>, vector<8x128xf32>, vector<8x128xf32>, vector<8x128xf32>, vector<8x128xf32>, vector<8x128xf32>, vector<8x128xf32>, vector<8x128xf32> -> vector<128x128xf32>
    %112 = tpu.concatenate %111, %110 in 0 : vector<128x128xf32>, vector<8x128xf32> -> vector<136x128xf32>
    %cst_36 = arith.constant 9.99999997E-7 : f32
    %113 = vector.broadcast %cst_36 : f32 to vector<136x128xf32>
    %114 = arith.addf %112, %113 : vector<136x128xf32>
    %115 = arith.mulf %114, %114 : vector<136x128xf32>
    %cst_37 = arith.constant dense<0.000000e+00> : vector<136xf32>
    %116 = vector.multi_reduction <add>, %115, %cst_37 [1] : vector<136x128xf32> to vector<136xf32>
    %117 = vector.shape_cast %116 : vector<136xf32> to vector<136x1xf32>
    %118 = math.sqrt %117 : vector<136x1xf32>
    %119 = vector.extract_strided_slice %118 {offsets = [0, 0], sizes = [8, 1], strides = [1, 1]} : vector<136x1xf32> to vector<8x1xf32>
    %120 = vector.extract_strided_slice %118 {offsets = [8, 0], sizes = [8, 1], strides = [1, 1]} : vector<136x1xf32> to vector<8x1xf32>
    %121 = vector.extract_strided_slice %118 {offsets = [16, 0], sizes = [8, 1], strides = [1, 1]} : vector<136x1xf32> to vector<8x1xf32>
    %122 = vector.extract_strided_slice %118 {offsets = [24, 0], sizes = [8, 1], strides = [1, 1]} : vector<136x1xf32> to vector<8x1xf32>
    %123 = vector.extract_strided_slice %118 {offsets = [32, 0], sizes = [8, 1], strides = [1, 1]} : vector<136x1xf32> to vector<8x1xf32>
    %124 = vector.extract_strided_slice %118 {offsets = [40, 0], sizes = [8, 1], strides = [1, 1]} : vector<136x1xf32> to vector<8x1xf32>
    %125 = vector.extract_strided_slice %118 {offsets = [48, 0], sizes = [8, 1], strides = [1, 1]} : vector<136x1xf32> to vector<8x1xf32>
    %126 = vector.extract_strided_slice %118 {offsets = [56, 0], sizes = [8, 1], strides = [1, 1]} : vector<136x1xf32> to vector<8x1xf32>
    %127 = arith.subf %120, %119 : vector<8x1xf32>
    %cst_38 = arith.constant 0.000000e+00 : f32
    %128 = vector.broadcast %cst_38 : f32 to vector<8x1xf32>
    %129 = arith.cmpf ogt, %127, %128 : vector<8x1xf32>
    %130 = arith.extui %129 : vector<8x1xi1> to vector<8x1xi32>
    %131 = arith.sitofp %130 : vector<8x1xi32> to vector<8x1xf32>
    %132 = arith.subf %120, %119 : vector<8x1xf32>
    %cst_39 = arith.constant 0.000000e+00 : f32
    %133 = vector.broadcast %cst_39 : f32 to vector<8x1xf32>
    %134 = arith.subf %133, %132 : vector<8x1xf32>
    %cst_40 = arith.constant 2.000000e-01 : f32
    %135 = vector.broadcast %cst_40 : f32 to vector<8x1xf32>
    %136 = arith.addf %134, %135 : vector<8x1xf32>
    %cst_41 = arith.constant 0.000000e+00 : f32
    %137 = vector.broadcast %cst_41 : f32 to vector<8x1xf32>
    %138 = arith.maximumf %137, %136 : vector<8x1xf32>
    %139 = arith.subf %121, %122 : vector<8x1xf32>
    %cst_42 = arith.constant 0.000000e+00 : f32
    %140 = vector.broadcast %cst_42 : f32 to vector<8x1xf32>
    %141 = arith.subf %140, %139 : vector<8x1xf32>
    %cst_43 = arith.constant 2.000000e-01 : f32
    %142 = vector.broadcast %cst_43 : f32 to vector<8x1xf32>
    %143 = arith.addf %141, %142 : vector<8x1xf32>
    %cst_44 = arith.constant 0.000000e+00 : f32
    %144 = vector.broadcast %cst_44 : f32 to vector<8x1xf32>
    %145 = arith.maximumf %144, %143 : vector<8x1xf32>
    %146 = arith.subf %121, %123 : vector<8x1xf32>
    %cst_45 = arith.constant 0.000000e+00 : f32
    %147 = vector.broadcast %cst_45 : f32 to vector<8x1xf32>
    %148 = arith.subf %147, %146 : vector<8x1xf32>
    %cst_46 = arith.constant 2.000000e-01 : f32
    %149 = vector.broadcast %cst_46 : f32 to vector<8x1xf32>
    %150 = arith.addf %148, %149 : vector<8x1xf32>
    %cst_47 = arith.constant 0.000000e+00 : f32
    %151 = vector.broadcast %cst_47 : f32 to vector<8x1xf32>
    %152 = arith.maximumf %151, %150 : vector<8x1xf32>
    %153 = arith.subf %124, %125 : vector<8x1xf32>
    %cst_48 = arith.constant 2.000000e-01 : f32
    %154 = vector.broadcast %cst_48 : f32 to vector<8x1xf32>
    %155 = arith.addf %153, %154 : vector<8x1xf32>
    %cst_49 = arith.constant 0.000000e+00 : f32
    %cst_50 = arith.constant 1.000000e+06 : f32
    %156 = vector.broadcast %cst_49 : f32 to vector<8x1xf32>
    %157 = arith.maximumf %156, %155 : vector<8x1xf32>
    %158 = vector.broadcast %cst_50 : f32 to vector<8x1xf32>
    %159 = arith.minimumf %158, %157 : vector<8x1xf32>
    %160 = arith.mulf %159, %93 : vector<8x1xf32>
    %161 = arith.subf %124, %126 : vector<8x1xf32>
    %cst_51 = arith.constant 2.000000e-01 : f32
    %162 = vector.broadcast %cst_51 : f32 to vector<8x1xf32>
    %163 = arith.addf %161, %162 : vector<8x1xf32>
    %cst_52 = arith.constant 0.000000e+00 : f32
    %cst_53 = arith.constant 1.000000e+06 : f32
    %164 = vector.broadcast %cst_52 : f32 to vector<8x1xf32>
    %165 = arith.maximumf %164, %163 : vector<8x1xf32>
    %166 = vector.broadcast %cst_53 : f32 to vector<8x1xf32>
    %167 = arith.minimumf %166, %165 : vector<8x1xf32>
    %168 = arith.mulf %167, %93 : vector<8x1xf32>
    %169 = vector.extract_strided_slice %118 {offsets = [64, 0], sizes = [8, 1], strides = [1, 1]} : vector<136x1xf32> to vector<8x1xf32>
    %170 = vector.extract_strided_slice %118 {offsets = [72, 0], sizes = [8, 1], strides = [1, 1]} : vector<136x1xf32> to vector<8x1xf32>
    %171 = arith.subf %169, %170 : vector<8x1xf32>
    %cst_54 = arith.constant 2.000000e-01 : f32
    %172 = vector.broadcast %cst_54 : f32 to vector<8x1xf32>
    %173 = arith.addf %171, %172 : vector<8x1xf32>
    %cst_55 = arith.constant 0.000000e+00 : f32
    %cst_56 = arith.constant 1.000000e+06 : f32
    %174 = vector.broadcast %cst_55 : f32 to vector<8x1xf32>
    %175 = arith.maximumf %174, %173 : vector<8x1xf32>
    %176 = vector.broadcast %cst_56 : f32 to vector<8x1xf32>
    %177 = arith.minimumf %176, %175 : vector<8x1xf32>
    %178 = arith.mulf %177, %89 : vector<8x1xf32>
    %179 = vector.extract_strided_slice %118 {offsets = [64, 0], sizes = [8, 1], strides = [1, 1]} : vector<136x1xf32> to vector<8x1xf32>
    %180 = vector.extract_strided_slice %118 {offsets = [80, 0], sizes = [8, 1], strides = [1, 1]} : vector<136x1xf32> to vector<8x1xf32>
    %181 = arith.subf %179, %180 : vector<8x1xf32>
    %cst_57 = arith.constant 2.000000e-01 : f32
    %182 = vector.broadcast %cst_57 : f32 to vector<8x1xf32>
    %183 = arith.addf %181, %182 : vector<8x1xf32>
    %cst_58 = arith.constant 0.000000e+00 : f32
    %cst_59 = arith.constant 1.000000e+06 : f32
    %184 = vector.broadcast %cst_58 : f32 to vector<8x1xf32>
    %185 = arith.maximumf %184, %183 : vector<8x1xf32>
    %186 = vector.broadcast %cst_59 : f32 to vector<8x1xf32>
    %187 = arith.minimumf %186, %185 : vector<8x1xf32>
    %188 = arith.mulf %187, %89 : vector<8x1xf32>
    %189 = vector.extract_strided_slice %118 {offsets = [88, 0], sizes = [8, 1], strides = [1, 1]} : vector<136x1xf32> to vector<8x1xf32>
    %190 = vector.extract_strided_slice %118 {offsets = [96, 0], sizes = [8, 1], strides = [1, 1]} : vector<136x1xf32> to vector<8x1xf32>
    %191 = arith.subf %189, %190 : vector<8x1xf32>
    %cst_60 = arith.constant 2.000000e-01 : f32
    %192 = vector.broadcast %cst_60 : f32 to vector<8x1xf32>
    %193 = arith.addf %191, %192 : vector<8x1xf32>
    %cst_61 = arith.constant 0.000000e+00 : f32
    %cst_62 = arith.constant 1.000000e+06 : f32
    %194 = vector.broadcast %cst_61 : f32 to vector<8x1xf32>
    %195 = arith.maximumf %194, %193 : vector<8x1xf32>
    %196 = vector.broadcast %cst_62 : f32 to vector<8x1xf32>
    %197 = arith.minimumf %196, %195 : vector<8x1xf32>
    %198 = arith.mulf %197, %90 : vector<8x1xf32>
    %199 = vector.extract_strided_slice %118 {offsets = [88, 0], sizes = [8, 1], strides = [1, 1]} : vector<136x1xf32> to vector<8x1xf32>
    %200 = vector.extract_strided_slice %118 {offsets = [104, 0], sizes = [8, 1], strides = [1, 1]} : vector<136x1xf32> to vector<8x1xf32>
    %201 = arith.subf %199, %200 : vector<8x1xf32>
    %cst_63 = arith.constant 2.000000e-01 : f32
    %202 = vector.broadcast %cst_63 : f32 to vector<8x1xf32>
    %203 = arith.addf %201, %202 : vector<8x1xf32>
    %cst_64 = arith.constant 0.000000e+00 : f32
    %cst_65 = arith.constant 1.000000e+06 : f32
    %204 = vector.broadcast %cst_64 : f32 to vector<8x1xf32>
    %205 = arith.maximumf %204, %203 : vector<8x1xf32>
    %206 = vector.broadcast %cst_65 : f32 to vector<8x1xf32>
    %207 = arith.minimumf %206, %205 : vector<8x1xf32>
    %208 = arith.mulf %207, %90 : vector<8x1xf32>
    %209 = vector.extract_strided_slice %118 {offsets = [112, 0], sizes = [8, 1], strides = [1, 1]} : vector<136x1xf32> to vector<8x1xf32>
    %210 = vector.extract_strided_slice %118 {offsets = [120, 0], sizes = [8, 1], strides = [1, 1]} : vector<136x1xf32> to vector<8x1xf32>
    %211 = arith.subf %209, %210 : vector<8x1xf32>
    %cst_66 = arith.constant 2.000000e-01 : f32
    %212 = vector.broadcast %cst_66 : f32 to vector<8x1xf32>
    %213 = arith.addf %211, %212 : vector<8x1xf32>
    %cst_67 = arith.constant 0.000000e+00 : f32
    %cst_68 = arith.constant 1.000000e+06 : f32
    %214 = vector.broadcast %cst_67 : f32 to vector<8x1xf32>
    %215 = arith.maximumf %214, %213 : vector<8x1xf32>
    %216 = vector.broadcast %cst_68 : f32 to vector<8x1xf32>
    %217 = arith.minimumf %216, %215 : vector<8x1xf32>
    %218 = arith.mulf %217, %91 : vector<8x1xf32>
    %219 = vector.extract_strided_slice %118 {offsets = [112, 0], sizes = [8, 1], strides = [1, 1]} : vector<136x1xf32> to vector<8x1xf32>
    %220 = vector.extract_strided_slice %118 {offsets = [128, 0], sizes = [8, 1], strides = [1, 1]} : vector<136x1xf32> to vector<8x1xf32>
    %221 = arith.subf %219, %220 : vector<8x1xf32>
    %cst_69 = arith.constant 2.000000e-01 : f32
    %222 = vector.broadcast %cst_69 : f32 to vector<8x1xf32>
    %223 = arith.addf %221, %222 : vector<8x1xf32>
    %cst_70 = arith.constant 0.000000e+00 : f32
    %cst_71 = arith.constant 1.000000e+06 : f32
    %224 = vector.broadcast %cst_70 : f32 to vector<8x1xf32>
    %225 = arith.maximumf %224, %223 : vector<8x1xf32>
    %226 = vector.broadcast %cst_71 : f32 to vector<8x1xf32>
    %227 = arith.minimumf %226, %225 : vector<8x1xf32>
    %228 = arith.mulf %227, %91 : vector<8x1xf32>
    %229 = vector.extract_strided_slice %59 {offsets = [0, 0], sizes = [8, 1], strides = [1, 1]} : vector<24x1xf32> to vector<8x1xf32>
    %230 = vector.extract_strided_slice %59 {offsets = [8, 0], sizes = [8, 1], strides = [1, 1]} : vector<24x1xf32> to vector<8x1xf32>
    %231 = vector.extract_strided_slice %59 {offsets = [16, 0], sizes = [8, 1], strides = [1, 1]} : vector<24x1xf32> to vector<8x1xf32>
    %232 = tpu.concatenate %131, %138, %145, %152, %160, %168, %178, %188, %198, %208, %218, %228, %93, %89, %90, %91 in 1 : vector<8x1xf32>, vector<8x1xf32>, vector<8x1xf32>, vector<8x1xf32>, vector<8x1xf32>, vector<8x1xf32>, vector<8x1xf32>, vector<8x1xf32>, vector<8x1xf32>, vector<8x1xf32>, vector<8x1xf32>, vector<8x1xf32>, vector<8x1xf32>, vector<8x1xf32>, vector<8x1xf32>, vector<8x1xf32> -> vector<8x16xf32>
    %233 = tpu.concatenate %229, %230, %231, %60 in 1 : vector<8x1xf32>, vector<8x1xf32>, vector<8x1xf32>, vector<8x1xf32> -> vector<8x4xf32>
    %234 = tpu.concatenate %232, %233 in 1 : vector<8x16xf32>, vector<8x4xf32> -> vector<8x20xf32>
    %cst_72 = arith.constant dense<0.000000e+00> : vector<20xf32>
    %235 = vector.multi_reduction <add>, %234, %cst_72 [0] : vector<8x20xf32> to vector<20xf32>
    %236 = vector.shape_cast %235 : vector<20xf32> to vector<1x20xf32>
    %237 = vector.extract_strided_slice %236 {offsets = [0, 0], sizes = [1, 1], strides = [1, 1]} : vector<1x20xf32> to vector<1x1xf32>
    %cst_73 = arith.constant 1.250000e-01 : f32
    %238 = vector.broadcast %cst_73 : f32 to vector<1x1xf32>
    %239 = arith.mulf %237, %238 : vector<1x1xf32>
    %240 = vector.extract_strided_slice %236 {offsets = [0, 1], sizes = [1, 1], strides = [1, 1]} : vector<1x20xf32> to vector<1x1xf32>
    %cst_74 = arith.constant 1.250000e-01 : f32
    %241 = vector.broadcast %cst_74 : f32 to vector<1x1xf32>
    %242 = arith.mulf %240, %241 : vector<1x1xf32>
    %243 = vector.extract_strided_slice %236 {offsets = [0, 2], sizes = [1, 1], strides = [1, 1]} : vector<1x20xf32> to vector<1x1xf32>
    %244 = vector.extract_strided_slice %236 {offsets = [0, 3], sizes = [1, 1], strides = [1, 1]} : vector<1x20xf32> to vector<1x1xf32>
    %245 = arith.addf %243, %244 : vector<1x1xf32>
    %cst_75 = arith.constant 6.250000e-02 : f32
    %246 = vector.broadcast %cst_75 : f32 to vector<1x1xf32>
    %247 = arith.mulf %245, %246 : vector<1x1xf32>
    %248 = vector.extract_strided_slice %236 {offsets = [0, 4], sizes = [1, 1], strides = [1, 1]} : vector<1x20xf32> to vector<1x1xf32>
    %249 = vector.extract_strided_slice %236 {offsets = [0, 5], sizes = [1, 1], strides = [1, 1]} : vector<1x20xf32> to vector<1x1xf32>
    %250 = arith.addf %248, %249 : vector<1x1xf32>
    %251 = vector.extract_strided_slice %236 {offsets = [0, 12], sizes = [1, 1], strides = [1, 1]} : vector<1x20xf32> to vector<1x1xf32>
    %cst_76 = arith.constant 1.000000e+00 : f32
    %252 = vector.broadcast %cst_76 : f32 to vector<1x1xf32>
    %253 = arith.maximumf %251, %252 : vector<1x1xf32>
    %cst_77 = arith.constant 2.000000e+00 : f32
    %254 = vector.broadcast %cst_77 : f32 to vector<1x1xf32>
    %255 = arith.mulf %254, %253 : vector<1x1xf32>
    %256 = arith.divf %250, %255 : vector<1x1xf32>
    %257 = vector.extract_strided_slice %236 {offsets = [0, 6], sizes = [1, 1], strides = [1, 1]} : vector<1x20xf32> to vector<1x1xf32>
    %258 = vector.extract_strided_slice %236 {offsets = [0, 7], sizes = [1, 1], strides = [1, 1]} : vector<1x20xf32> to vector<1x1xf32>
    %259 = arith.addf %257, %258 : vector<1x1xf32>
    %260 = vector.extract_strided_slice %236 {offsets = [0, 13], sizes = [1, 1], strides = [1, 1]} : vector<1x20xf32> to vector<1x1xf32>
    %cst_78 = arith.constant 1.000000e+00 : f32
    %261 = vector.broadcast %cst_78 : f32 to vector<1x1xf32>
    %262 = arith.maximumf %260, %261 : vector<1x1xf32>
    %cst_79 = arith.constant 2.000000e+00 : f32
    %263 = vector.broadcast %cst_79 : f32 to vector<1x1xf32>
    %264 = arith.mulf %263, %262 : vector<1x1xf32>
    %265 = arith.divf %259, %264 : vector<1x1xf32>
    %266 = vector.extract_strided_slice %236 {offsets = [0, 8], sizes = [1, 1], strides = [1, 1]} : vector<1x20xf32> to vector<1x1xf32>
    %267 = vector.extract_strided_slice %236 {offsets = [0, 9], sizes = [1, 1], strides = [1, 1]} : vector<1x20xf32> to vector<1x1xf32>
    %268 = arith.addf %266, %267 : vector<1x1xf32>
    %269 = vector.extract_strided_slice %236 {offsets = [0, 14], sizes = [1, 1], strides = [1, 1]} : vector<1x20xf32> to vector<1x1xf32>
    %cst_80 = arith.constant 1.000000e+00 : f32
    %270 = vector.broadcast %cst_80 : f32 to vector<1x1xf32>
    %271 = arith.maximumf %269, %270 : vector<1x1xf32>
    %cst_81 = arith.constant 2.000000e+00 : f32
    %272 = vector.broadcast %cst_81 : f32 to vector<1x1xf32>
    %273 = arith.mulf %272, %271 : vector<1x1xf32>
    %274 = arith.divf %268, %273 : vector<1x1xf32>
    %275 = vector.extract_strided_slice %236 {offsets = [0, 10], sizes = [1, 1], strides = [1, 1]} : vector<1x20xf32> to vector<1x1xf32>
    %276 = vector.extract_strided_slice %236 {offsets = [0, 11], sizes = [1, 1], strides = [1, 1]} : vector<1x20xf32> to vector<1x1xf32>
    %277 = arith.addf %275, %276 : vector<1x1xf32>
    %278 = vector.extract_strided_slice %236 {offsets = [0, 15], sizes = [1, 1], strides = [1, 1]} : vector<1x20xf32> to vector<1x1xf32>
    %cst_82 = arith.constant 1.000000e+00 : f32
    %279 = vector.broadcast %cst_82 : f32 to vector<1x1xf32>
    %280 = arith.maximumf %278, %279 : vector<1x1xf32>
    %cst_83 = arith.constant 2.000000e+00 : f32
    %281 = vector.broadcast %cst_83 : f32 to vector<1x1xf32>
    %282 = arith.mulf %281, %280 : vector<1x1xf32>
    %283 = arith.divf %277, %282 : vector<1x1xf32>
    %284 = arith.addf %265, %274 : vector<1x1xf32>
    %285 = arith.addf %284, %283 : vector<1x1xf32>
    %cst_84 = arith.constant 3.000000e+00 : f32
    %286 = vector.broadcast %cst_84 : f32 to vector<1x1xf32>
    %287 = arith.divf %285, %286 : vector<1x1xf32>
    %288 = vector.extract_strided_slice %236 {offsets = [0, 16], sizes = [1, 3], strides = [1, 1]} : vector<1x20xf32> to vector<1x3xf32>
    %289 = math.sqrt %288 : vector<1x3xf32>
    %290 = vector.extract_strided_slice %289 {offsets = [0, 0], sizes = [1, 1], strides = [1, 1]} : vector<1x3xf32> to vector<1x1xf32>
    %291 = vector.extract_strided_slice %289 {offsets = [0, 1], sizes = [1, 1], strides = [1, 1]} : vector<1x3xf32> to vector<1x1xf32>
    %292 = arith.addf %290, %291 : vector<1x1xf32>
    %293 = vector.extract_strided_slice %289 {offsets = [0, 2], sizes = [1, 1], strides = [1, 1]} : vector<1x3xf32> to vector<1x1xf32>
    %294 = arith.addf %292, %293 : vector<1x1xf32>
    %cst_85 = arith.constant 3.000000e+00 : f32
    %295 = vector.broadcast %cst_85 : f32 to vector<1x1xf32>
    %296 = arith.divf %294, %295 : vector<1x1xf32>
    %297 = vector.extract_strided_slice %236 {offsets = [0, 19], sizes = [1, 1], strides = [1, 1]} : vector<1x20xf32> to vector<1x1xf32>
    %cst_86 = arith.constant 1.250000e-01 : f32
    %298 = vector.broadcast %cst_86 : f32 to vector<1x1xf32>
    %299 = arith.mulf %297, %298 : vector<1x1xf32>
    %cst_87 = arith.constant 0.353553385 : f32
    %300 = vector.broadcast %cst_87 : f32 to vector<1x1xf32>
    %301 = arith.mulf %296, %300 : vector<1x1xf32>
    %cst_88 = arith.constant 0.000000e+00 : f32
    %302 = vector.broadcast %cst_88 : f32 to vector<1x121xf32>
    %303 = tpu.concatenate %239, %242, %247, %256, %287, %299, %301, %302 in 1 : vector<1x1xf32>, vector<1x1xf32>, vector<1x1xf32>, vector<1x1xf32>, vector<1x1xf32>, vector<1x1xf32>, vector<1x1xf32>, vector<1x121xf32> -> vector<1x128xf32>
    %c0_89 = arith.constant 0 : index
    %c0_90 = arith.constant 0 : index
    %304 = vector.load %arg12[%c0_89, %c0_90] : memref<1x128xf32, #tpu.memory_space<vmem>>, vector<1x128xf32>
    tpu.vector_store %arg12[%c0_89, %c0_90], %303 {strides = array<i32>} : memref<1x128xf32, #tpu.memory_space<vmem>>, vector<1x128xf32>,
    return
  }
}

</mosaic_0001>

<bundles_post_ra>
// kernel: triple_network_forward.1
= control target key start
LH: loop header
LB: loop body
LE: loop exit
PB: predicated region body
PF: predicated region fallthrough
CT: control target
= control target key end

     0   :  { %s2140_s14 = smov 12   ;;  %s2143_s15 = smov 5   ;;  %s2808_s1 = inlined_call_operand.vmem [shape: bf16[1024,128], index: 1, kind: input, shape index: {}]   ;;  %s2809_s0 = inlined_call_operand.vmem [shape: bf16[24,1024], index: 0, kind: input, shape index: {}]   ;;  %s2810_s5 = inlined_call_operand.vmem [shape: bf16[128,128], index: 5, kind: input, shape index: {}]   ;;  %s2811_s4 = inlined_call_operand.vmem [shape: bf16[24,128], index: 4, kind: input, shape index: {}]   ;;  %s2812_s9 = inlined_call_operand.vmem [shape: bf16[128,128], index: 9, kind: input, shape index: {}]   ;;  %s2813_s2 = inlined_call_operand.vmem [shape: f32[1,128], index: 2, kind: input, shape index: {}]   ;;  %s2814_s6 = inlined_call_operand.vmem [shape: f32[1,128], index: 6, kind: input, shape index: {}]   ;;  %s2815_s7 = inlined_call_operand.vmem [shape: f32[1,128], index: 7, kind: input, shape index: {}]   ;;  %s2816_s8 = inlined_call_operand.vmem [shape: f32[1,128], index: 8, kind: input, shape index: {}]   ;;  %s2817_s10 = inlined_call_operand.vmem [shape: f32[1,128], index: 10, kind: input, shape index: {}]   ;;  %s2818_s3 = inlined_call_operand.vmem [shape: f32[8,128], index: 3, kind: input, shape index: {}]   ;;  %s2819_s11 = inlined_call_operand.vmem [shape: f32[24,1], index: 11, kind: input, shape index: {}]   ;;  %s2820_s12 = inlined_call_operand.vmem [shape: f32[1,128], index: 12, kind: output, shape index: {}]  }
   0x1   :  { %v1982_v0 = vld [vmem:[%s2808_s1 + $0x78] sm:$0xff]   ;;  %v1986_v4 = vld [vmem:[%s2808_s1 + $0x70] sm:$0xff]   ;;  %v1990_v8 = vld [vmem:[%s2808_s1 + $0x68] sm:$0xff]   ;;  %s2144_s16 = smov 6   ;;  %s2145_s17 = smov 9  }
   0x2   :  { %v1983_v1 = vld [vmem:[%s2808_s1 + $0x38] sm:$0xff]   ;;  %1787 = vmatprep.subr.bf16.mxu0 %v1982_v0  ;;  %v1987_v5 = vld [vmem:[%s2808_s1 + $0x30] sm:$0xff]   ;;  %v1991_v9 = vld [vmem:[%s2808_s1 + $0x28] sm:$0xff]   ;;  %s2147_s18 = smov 13   ;;  %s2148_s19 = smov 4  }
   0x3   :  { %v1984_v2 = vld [vmem:[%s2808_s1 + $0xf8] sm:$0xff]   ;;  %1788 = vmatpush3.bf16.msra.mxu0 %v1983_v1  ;;  %v1988_v6 = vld [vmem:[%s2808_s1 + $0xf0] sm:$0xff]   ;;  %v1992_v10 = vld [vmem:[%s2808_s1 + $0xe8] sm:$0xff]   ;;  %s2149_s20 = smov 15   ;;  %s2150_s21 = smov 8  }
   0x4   :  { %v1985_v3 = vld [vmem:[%s2808_s1 + $0xb8] sm:$0xff]   ;;  %1815 = vmatprep.subr.bf16.mxu1 %v1984_v2  ;;  %1789 = vmatprep.subr.bf16.mxu0 %v1986_v4  ;;  %v1989_v7 = vld [vmem:[%s2808_s1 + $0xb0] sm:$0xff]   ;;  %v1993_v11 = vld [vmem:[%s2808_s1 + $0xa8] sm:$0xff]   ;;  %s2151_s22 = smov 14   ;;  %s2152_s23 = smov 16  }
   0x5   :  { %1816 = vmatpush3.bf16.msra.mxu1 %v1985_v3  ;;  %v1994_v12 = vld [vmem:[%s2808_s1 + $0x60] sm:$0xff]   ;;  %v1998_v16 = vld [vmem:[%s2808_s1 + $0x58] sm:$0xff]   ;;  %v2002_v20 = vld [vmem:[%s2808_s1 + $0x50] sm:$0xff]   ;;  %s2154_s24 = smov 123   ;;  %s2158_s25 = smov 120  }
   0x6   :  { %1817 = vmatprep.subr.bf16.mxu1 %v1988_v6  ;;  %v1995_v13 = vld [vmem:[%s2808_s1 + $0x20] sm:$0xff]   ;;  %v1999_v17 = vld [vmem:[%s2808_s1 + $0x18] sm:$0xff]   ;;  %v2003_v21 = vld [vmem:[%s2808_s1 + $0x10] sm:$0xff]   ;;  %s2159_s26 = smov 126   ;;  %s2160_s27 = smov 124  }
   0x7   :  { %1790 = vmatpush3.bf16.msra.mxu0 %v1987_v5  ;;  %v1996_v14 = vld [vmem:[%s2808_s1 + $0xe0] sm:$0xff]   ;;  %v2000_v18 = vld [vmem:[%s2808_s1 + $0xd8] sm:$0xff]   ;;  %v2004_v22 = vld [vmem:[%s2808_s1 + $0xd0] sm:$0xff]  }
   0x8   :  { %1791 = vmatprep.subr.bf16.mxu0 %v1990_v8  ;;  %v1997_v15 = vld [vmem:[%s2808_s1 + $0xa0] sm:$0xff]   ;;  %v2001_v19 = vld [vmem:[%s2808_s1 + $0x98] sm:$0xff]   ;;  %v2005_v23 = vld [vmem:[%s2808_s1 + $0x90] sm:$0xff]  }
   0x9   :  { %1818 = vmatpush3.bf16.msra.mxu1 %v1989_v7  ;;  %v2006_v24 = vld [vmem:[%s2808_s1 + $0x48] sm:$0xff]   ;;  %v2010_v28 = vld [vmem:[%s2808_s1 + $0x40] sm:$0xff]   ;;  %v2014_v36 = vld [vmem:[%s2808_s1 + $0x178] sm:$0xff]  }
   0xa   :  { %1819 = vmatprep.subr.bf16.mxu1 %v1992_v10  ;;  %v2007_v25 = vld [vmem:[%s2808_s1 + $0x8] sm:$0xff]   ;;  %v2011_v29 = vld [vmem:[%s2808_s1] sm:$0xff]   ;;  %v2015_v41 = vld [vmem:[%s2808_s1 + $0x138] sm:$0xff]  }
   0xb   :  { %1792 = vmatpush3.bf16.msra.mxu0 %v1991_v9  ;;  %v2008_v26 = vld [vmem:[%s2808_s1 + $0xc8] sm:$0xff]   ;;  %v2012_v30 = vld [vmem:[%s2808_s1 + $0xc0] sm:$0xff]   ;;  %v2016_v42 = vld [vmem:[%s2808_s1 + $0x1f8] sm:$0xff]  }
   0xc   :  { %1793 = vmatprep.subr.bf16.mxu0 %v1994_v12  ;;  %v2009_v27 = vld [vmem:[%s2808_s1 + $0x88] sm:$0xff]   ;;  %v42_v31 = vld [vmem:[%s2809_s0] sm:$0xff]  ;;  %v2017_v43 = vld [vmem:[%s2808_s1 + $0x1b8] sm:$0xff]  }
   0xd   :  { %1820 = vmatpush3.bf16.msra.mxu1 %v1993_v11  ;;  %v46_v32 = vld [vmem:[%s2809_s0 + $0x20] sm:$0xff]  ;;  %v43_v37 = vld [vmem:[%s2809_s0 + $0x8] sm:$0xff]  ;;  %v2018_v44 = vld [vmem:[%s2808_s1 + $0x170] sm:$0xff]  }
   0xe   :  { %1821 = vmatprep.subr.bf16.mxu1 %v1996_v14  ;;  %v1684_v33 = vcombine.low %v42_v31, %v46_v32  ;;  %v1685_v34 = vcombine.high %v42_v31, %v46_v32  ;;  %v2013_v35 = vld [vmem:[%s2808_s1 + $0x80] sm:$0xff]   ;;  %v47_v38 = vld [vmem:[%s2809_s0 + $0x28] sm:$0xff]  ;;  %v2019_v45 = vld [vmem:[%s2808_s1 + $0x130] sm:$0xff]  }
   0xf   :  { %1794 = vmatpush3.bf16.msra.mxu0 %v1995_v13  ;;  %v1686_v39 = vcombine.low %v43_v37, %v47_v38  ;;  %v1687_v40 = vcombine.high %v43_v37, %v47_v38  ;;  %v2020_v46 = vld [vmem:[%s2808_s1 + $0x1f0] sm:$0xff]   ;;  %v2022_v48 = vld [vmem:[%s2808_s1 + $0x168] sm:$0xff]   ;;  %v2026_v52 = vld [vmem:[%s2808_s1 + $0x160] sm:$0xff]  }
  0x10   :  { %1795 = vmatprep.subr.bf16.mxu0 %v1998_v16  ;;  %673 = vmatprep.mubr.bf16.mxu0 %v1685_v34  ;;  %v2021_v47 = vld [vmem:[%s2808_s1 + $0x1b0] sm:$0xff]   ;;  %v2023_v49 = vld [vmem:[%s2808_s1 + $0x128] sm:$0xff]   ;;  %v2027_v53 = vld [vmem:[%s2808_s1 + $0x120] sm:$0xff]  }
  0x11   :  { %1822 = vmatpush3.bf16.msra.mxu1 %v1997_v15  ;;  %721 = vmatprep.mubr.bf16.mxu1 %v1687_v40  ;;  %v2024_v50 = vld [vmem:[%s2808_s1 + $0x1e8] sm:$0xff]   ;;  %v2028_v54 = vld [vmem:[%s2808_s1 + $0x1e0] sm:$0xff]   ;;  %v2030_v56 = vld [vmem:[%s2808_s1 + $0x158] sm:$0xff]  }
  0x12   :  { %1823 = vmatprep.subr.bf16.mxu1 %v2000_v18  ;;  %v2025_v51 = vld [vmem:[%s2808_s1 + $0x1a8] sm:$0xff]   ;;  %v2029_v55 = vld [vmem:[%s2808_s1 + $0x1a0] sm:$0xff]   ;;  %v2031_v57 = vld [vmem:[%s2808_s1 + $0x118] sm:$0xff]  }
  0x13   :  { %1796 = vmatpush3.bf16.msra.mxu0 %v1999_v17  ;;  %v50_v58 = vld [vmem:[%s2809_s0 + $0x40] sm:$0xff]  ;;  %v2033_v60 = vld [vmem:[%s2808_s1 + $0x1d8] sm:$0xff]   ;;  %v2036_v63 = vld [vmem:[%s2808_s1 + $0x150] sm:$0xff]  }
  0x14   :  { %1797 = vmatprep.subr.bf16.mxu0 %v2002_v20  ;;  %v1693_v59 = vcombine.high %v50_v58, %v50_v58  ;;  %v1692_v61 = vcombine.low %v50_v58, %v50_v58  ;;  %v2035_v62 = vld [vmem:[%s2808_s1 + $0x198] sm:$0xff]   ;;  %v2037_v0 = vld [vmem:[%s2808_s1 + $0x110] sm:$0xff]   ;;  %v51_v3 = vld [vmem:[%s2809_s0 + $0x48] sm:$0xff] }
  0x15   :  { %1824 = vmatpush3.bf16.msra.mxu1 %v2001_v19  ;;  %v2038_v1 = vld [vmem:[%s2808_s1 + $0x1d0] sm:$0xff]   ;;  %v1695_v4 = vcombine.high %v51_v3, %v51_v3  ;;  %v2041_v5 = vld [vmem:[%s2808_s1 + $0x148] sm:$0xff]   ;;  %v1694_v6 = vcombine.low %v51_v3, %v51_v3  ;;  %v2046_v10 = vld [vmem:[%s2808_s1 + $0x140] sm:$0xff]  }
  0x16   :  { %1825 = vmatprep.subr.bf16.mxu1 %v2004_v22  ;;  %v2039_v2 = vld [vmem:[%s2808_s1 + $0x190] sm:$0xff]   ;;  %v2043_v7 = vld [vmem:[%s2808_s1 + $0x108] sm:$0xff]   ;;  %v2047_v11 = vld [vmem:[%s2808_s1 + $0x100] sm:$0xff]  }
  0x17   :  { %1798 = vmatpush3.bf16.msra.mxu0 %v2003_v21  ;;  %v2044_v8 = vld [vmem:[%s2808_s1 + $0x1c8] sm:$0xff]   ;;  %v2048_v12 = vld [vmem:[%s2808_s1 + $0x1c0] sm:$0xff]   ;;  %v44_v13 = vld [vmem:[%s2809_s0 + $0x10] sm:$0xff] }
  0x18   :  { %1799 = vmatprep.subr.bf16.mxu0 %v2006_v24  ;;  %v2045_v9 = vld [vmem:[%s2808_s1 + $0x188] sm:$0xff]   ;;  %v48_v14 = vld [vmem:[%s2809_s0 + $0x30] sm:$0xff]  ;;  %v2049_v17 = vld [vmem:[%s2808_s1 + $0x180] sm:$0xff]   ;;  %s2162_s1 = smov 118  }
  0x19   :  { %1826 = vmatpush3.bf16.msra.mxu1 %v2005_v23  ;;  %v1688_v15 = vcombine.low %v44_v13, %v48_v14  ;;  %v1689_v16 = vcombine.high %v44_v13, %v48_v14  ;;  %v2050_v18 = vld [vmem:[%s2810_s5 + $0x38] sm:$0xff]   ;;  %v2051_v23 = vld [vmem:[%s2810_s5 + $0x30] sm:$0xff]   ;;  %v2062_v32 = vld [vmem:[%s2811_s4] sm:$0xff]  }
  0x1a   :  { %1827 = vmatprep.subr.bf16.mxu1 %v2008_v26  ;;  %v45_v19 = vld [vmem:[%s2809_s0 + $0x18] sm:$0xff]  ;;  %v52_v24 = vld [vmem:[%s2809_s0 + $0x50] sm:$0xff]  ;;  %v2063_v37 = vld [vmem:[%s2811_s4 + $0x8] ss:$0 sps:$4 sm:$0xff]   ;;  %s2142_s4 = smov 10  }
  0x1b   :  { %1800 = vmatpush3.bf16.msra.mxu0 %v2007_v25  ;;  %v49_v20 = vld [vmem:[%s2809_s0 + $0x38] sm:$0xff]  ;;  %v1697_v25 = vcombine.high %v52_v24, %v52_v24  ;;  %v2059_v34 = vld [vmem:[%s2810_s5 + $0x10] sm:$0xff]   ;;  %v2066_v40 = vld [vmem:[%s2812_s9 + $0x28] sm:$0xff]  }
  0x1c   :  { %1801 = vmatprep.subr.bf16.mxu0 %v2010_v28  ;;  %v1690_v21 = vcombine.low %v45_v19, %v49_v20  ;;  %v1691_v22 = vcombine.high %v45_v19, %v49_v20  ;;  %v53_v26 = vld [vmem:[%s2809_s0 + $0x58] sm:$0xff]  ;;  %s2146_s0 = smov 7  }
  0x1d   :  { %1828 = vmatpush3.bf16.msra.mxu1 %v2009_v27  ;;  %v2054_v27 = vld [vmem:[%s2810_s5 + $0x28] sm:$0xff]   ;;  %v1699_v28 = vcombine.high %v53_v26, %v53_v26  ;;  %v1698_v31 = vcombine.low %v53_v26, %v53_v26  ;;  %v2064_v38 = vld [vmem:[%s2812_s9 + $0x38] sm:$0xff]  }
  0x1e   :  { %1829 = vmatprep.subr.bf16.mxu1 %v2012_v30  ;;  %v2057_v30 = vld [vmem:[%s2810_s5 + $0x20] sm:$0xff]  }
  0x1f   :  { %1802 = vmatpush3.bf16.msra.mxu0 %v2011_v29  ;;  %v1696_v29 = vcombine.low %v52_v24, %v52_v24 }
  0x20   :  { %1843 = vmatprep.subr.bf16.mxu0 %v2014_v36  ;;  %v2061_v36 = vld [vmem:[%s2810_s5] sm:$0xff]  }
  0x21   :  { %1830 = vmatpush3.bf16.msra.mxu1 %v2013_v35  ;;  %v2060_v35 = vld [vmem:[%s2810_s5 + $0x8] sm:$0xff]  }
  0x22   :  { %674 = vmatmul.mubr.bf16.vlgmr.msra.gmra.mxu0 %v1684_v33  ;;  %1871 = vmatprep.subr.bf16.mxu1 %v2016_v42  ;;  %v2058_v33 = vld [vmem:[%s2810_s5 + $0x18] sm:$0xff]  }
  0x23   :  { %1844 = vmatpush3.bf16.msra.mxu0 %v2015_v41  ;;  %681 = vmatprep.mubr.bf16.mxu0 %v1693_v59  ;;  %v2067_v41 = vld [vmem:[%s2812_s9 + $0x20] sm:$0xff]   ;;  %v2068_v42 = vld [vmem:[%s2812_s9 + $0x18] sm:$0xff]  }
  0x24   :  { %722 = vmatmul.mubr.bf16.vlgmr.msra.gmra.mxu1 %v1686_v39  ;;  %1845 = vmatprep.subr.bf16.mxu0 %v2018_v44  ;;  %v2065_v39 = vld [vmem:[%s2812_s9 + $0x30] sm:$0xff]   ;;  %v2070_v44 = vld [vmem:[%s2812_s9 + $0x8] sm:$0xff]  }
  0x25   :  { %1872 = vmatpush3.bf16.msra.mxu1 %v2017_v43  ;;  %729 = vmatprep.mubr.bf16.mxu1 %v1695_v4  ;;  %v2069_v43 = vld [vmem:[%s2812_s9 + $0x10] sm:$0xff]  }
  0x26   :  { %1873 = vmatprep.subr.bf16.mxu1 %v2020_v46 }
  0x27   :  { %1846 = vmatpush3.bf16.msra.mxu0 %v2019_v45  ;;  %v2071_v45 = vld [vmem:[%s2812_s9] sm:$0xff]   ;;  %s2156_s9 = smov 121  }
  0x28   :  { %1847 = vmatprep.subr.bf16.mxu0 %v2022_v48 }
  0x29   :  { %1874 = vmatpush3.bf16.msra.mxu1 %v2021_v47 }
  0x2a   :  { %1875 = vmatprep.subr.bf16.mxu1 %v2024_v50  ;;  %682 = vmatmul.mubr.bf16.gmra.mxu0 %v1692_v61 }
  0x2b   :  { %1848 = vmatpush3.bf16.msra.mxu0 %v2023_v49  ;;  %769 = vmatprep.mubr.bf16.mxu0 %v1689_v16 }
  0x2c   :  { %1849 = vmatprep.subr.bf16.mxu0 %v2026_v52  ;;  %730 = vmatmul.mubr.bf16.gmra.mxu1 %v1694_v6 }
  0x2d   :  { %1876 = vmatpush3.bf16.msra.mxu1 %v2025_v51  ;;  %817 = vmatprep.mubr.bf16.mxu1 %v1691_v22 }
  0x2e   :  { %1877 = vmatprep.subr.bf16.mxu1 %v2028_v54  ;;  %v1683_v54 = vld [vmem:[%s2813_s2] ss:$0 sm:$0xff]  ;;  %s2155_s2 = smov 122  }
  0x2f   :  { %1850 = vmatpush3.bf16.msra.mxu0 %v2027_v53 }
  0x30   :  { %1851 = vmatprep.subr.bf16.mxu0 %v2030_v56 }
  0x31   :  { %1878 = vmatpush3.bf16.msra.mxu1 %v2029_v55 }
  0x32   :  { %1879 = vmatprep.subr.bf16.mxu1 %v2033_v60 }
  0x33   :  { %1852 = vmatpush3.bf16.msra.mxu0 %v2031_v57 }
  0x34   :  { %1853 = vmatprep.subr.bf16.mxu0 %v2036_v63 }
  0x35   :  { %1880 = vmatpush3.bf16.msra.mxu1 %v2035_v62 }
  0x36   :  { %1881 = vmatprep.subr.bf16.mxu1 %v2038_v1 }
  0x37   :  { %1854 = vmatpush3.bf16.msra.mxu0 %v2037_v0 }
  0x38   :  { %1855 = vmatprep.subr.bf16.mxu0 %v2041_v5 }
  0x39   :  { %1882 = vmatpush3.bf16.msra.mxu1 %v2039_v2 }
  0x3a   :  { %1883 = vmatprep.subr.bf16.mxu1 %v2044_v8 }
  0x3b   :  { %1856 = vmatpush3.bf16.msra.mxu0 %v2043_v7 }
  0x3c   :  { %1857 = vmatprep.subr.bf16.mxu0 %v2046_v10 }
  0x3d   :  { %1884 = vmatpush3.bf16.msra.mxu1 %v2045_v9 }
  0x3e   :  { %1885 = vmatprep.subr.bf16.mxu1 %v2048_v12 }
  0x3f   :  { %1858 = vmatpush3.bf16.msra.mxu0 %v2047_v11 }
  0x40   :  { %1919 = vmatprep.subr.bf16.mxu0 %v2050_v18 }
  0x41   :  { %1886 = vmatpush3.bf16.msra.mxu1 %v2049_v17 }
  0x42   :  { %770 = vmatmul.mubr.bf16.vlgmr.msra.gmra.mxu0 %v1688_v15  ;;  %1939 = vmatprep.subr.bf16.mxu1 %v2064_v38 }
  0x43   :  { %1920 = vmatpush3.bf16.msra.mxu0 %v2050_v18  ;;  %777 = vmatprep.mubr.bf16.mxu0 %v1697_v25 }
  0x44   :  { %1921 = vmatprep.subr.bf16.mxu0 %v2051_v23  ;;  %818 = vmatmul.mubr.bf16.vlgmr.msra.gmra.mxu1 %v1690_v21 }
  0x45   :  { %825 = vmatprep.mubr.bf16.mxu1 %v1699_v28  ;;  %1940 = vmatpush3.bf16.msra.mxu1 %v2064_v38 }
  0x46   :  { %1941 = vmatprep.subr.bf16.mxu1 %v2065_v39 }
  0x47   :  { %1922 = vmatpush3.bf16.msra.mxu0 %v2051_v23 }
  0x48   :  { %1923 = vmatprep.subr.bf16.mxu0 %v2054_v27 }
  0x49   :  { %1942 = vmatpush3.bf16.msra.mxu1 %v2065_v39 }
  0x4a   :  { %778 = vmatmul.mubr.bf16.gmra.mxu0 %v1696_v29  ;;  %1943 = vmatprep.subr.bf16.mxu1 %v2066_v40 }
  0x4b   :  { %1924 = vmatpush3.bf16.msra.mxu0 %v2054_v27  ;;  %1935 = vmatprep.mubr.bf16.mxu0 %v2062_v32 }
  0x4c   :  { %1925 = vmatprep.subr.bf16.mxu0 %v2057_v30  ;;  %826 = vmatmul.mubr.bf16.gmra.mxu1 %v1698_v31 }
  0x4d   :  { %1944 = vmatpush3.bf16.msra.mxu1 %v2066_v40  ;;  %v1764_v40 = vld [vmem:[%s2814_s6] ss:$0 sm:$0xff]  ;;  %s2157_s6 = smov 127  }
  0x4e   :  { %1945 = vmatprep.subr.bf16.mxu1 %v2067_v41 }
  0x4f   :  { %1926 = vmatpush3.bf16.msra.mxu0 %v2057_v30 }
  0x50   :  { %1927 = vmatprep.subr.bf16.mxu0 %v2058_v33 }
  0x51   :  { %1946 = vmatpush3.bf16.msra.mxu1 %v2067_v41 }
  0x52   :  { %1947 = vmatprep.subr.bf16.mxu1 %v2068_v42 }
  0x53   :  { %1928 = vmatpush3.bf16.msra.mxu0 %v2058_v33 }
  0x54   :  { %1929 = vmatprep.subr.bf16.mxu0 %v2059_v34 }
  0x55   :  { %1948 = vmatpush3.bf16.msra.mxu1 %v2068_v42 }
  0x56   :  { %1949 = vmatprep.subr.bf16.mxu1 %v2069_v43 }
  0x57   :  { %1930 = vmatpush3.bf16.msra.mxu0 %v2059_v34 }
  0x58   :  { %1931 = vmatprep.subr.bf16.mxu0 %v2060_v35 }
  0x59   :  { %1950 = vmatpush3.bf16.msra.mxu1 %v2069_v43 }
  0x5a   :  { %1951 = vmatprep.subr.bf16.mxu1 %v2070_v44 }
  0x5b   :  { %1932 = vmatpush3.bf16.msra.mxu0 %v2060_v35 }
  0x5c   :  { %1933 = vmatprep.subr.bf16.mxu0 %v2061_v36 }
  0x5d   :  { %1952 = vmatpush3.bf16.msra.mxu1 %v2070_v44 }
  0x5e   :  { %1953 = vmatprep.subr.bf16.mxu1 %v2071_v45 }
  0x5f   :  { %1934 = vmatpush3.bf16.msra.mxu0 %v2061_v36 }
  0x61   :  { %1954 = vmatpush3.bf16.msra.mxu1 %v2071_v45 }
  0x62   :  { %1936 = vmatmul.mubr.bf16.vlgmr.msra.gmra.mxu0 %v2063_v37 }
  0xe2   :  { %v1803_v46 = vpop.f32.mrf.mxu0 }
  0xe4   :  { %v1804_v47 = vpop.f32.mrf.mxu0  ;;  %v1831_v48 = vpop.f32.mrf.mxu1 }
  0xe5   :  { %v1805_v3 = vadd.f32 %v1804_v47, %v1803_v46 }
  0xe6   :  { %v1806_v49 = vpop.f32.mrf.mxu0  ;;  %v1832_v50 = vpop.f32.mrf.mxu1 }
  0xe7   :  { %v676_v8 = vadd.f32 %v1805_v3, %v1683_v54  ;;  %v1833_v9 = vadd.f32 %v1832_v50, %v1831_v48 }
  0xe8   :  { %v1807_v51 = vpop.f32.mrf.mxu0  ;;  %v1834_v53 = vpop.f32.mrf.mxu1 }
  0xe9   :  { %v1808_v52 = vadd.f32 %v1807_v51, %v1806_v49  ;;  %v724_v12 = vadd.f32 %v1833_v9, %v676_v8 }
  0xea   :  { %v1835_v56 = vpop.f32.mrf.mxu1  ;;  %v1809_v59 = vpop.f32.mrf.mxu0 }
  0xeb   :  { %v679_v55 = vadd.f32 %v1808_v52, %v1683_v54  ;;  %v1836_v57 = vadd.f32 %v1835_v56, %v1834_v53 }
  0xec   :  { %v1810_v60 = vpop.f32.mrf.mxu0  ;;  %v1837_v1 = vpop.f32.mrf.mxu1 }
  0xed   :  { %v727_v58 = vadd.f32 %v1836_v57, %v679_v55  ;;  %v1811_v61 = vadd.f32 %v1810_v60, %v1809_v59 }
  0xee   :  { %v1812_v62 = vpop.f32.mrf.mxu0  ;;  %v1838_v2 = vpop.f32.mrf.mxu1 }
  0xef   :  { %v684_v63 = vadd.f32 %v1811_v61, %v1683_v54  ;;  %v1839_v4 = vadd.f32 %v1838_v2, %v1837_v1 }
  0xf0   :  { %v1813_v0 = vpop.f32.mrf.mxu0  ;;  %v1840_v5 = vpop.f32.mrf.mxu1 }
  0xf1   :  { %v732_v6 = vadd.f32 %v1839_v4, %v684_v63 }
  0xf2   :  { %v1841_v7 = vpop.f32.mrf.mxu1 }
 0x102   :  { %v1859_v10 = vpop.f32.mrf.mxu0 }
 0x104   :  { %v1860_v11 = vpop.f32.mrf.mxu0  ;;  %v1887_v14 = vpop.f32.mrf.mxu1 }
 0x105   :  { %v1861_v13 = vadd.f32 %v1860_v11, %v1859_v10 }
 0x106   :  { %v1862_v15 = vpop.f32.mrf.mxu0  ;;  %v1888_v17 = vpop.f32.mrf.mxu1 }
 0x107   :  { %v772_v16 = vadd.f32 %v1861_v13, %v724_v12  ;;  %v1889_v18 = vadd.f32 %v1888_v17, %v1887_v14 }
 0x108   :  { %v1863_v19 = vpop.f32.mrf.mxu0  ;;  %v1890_v21 = vpop.f32.mrf.mxu1 }
 0x109   :  { %v1864_v20 = vadd.f32 %v1863_v19, %v1862_v15  ;;  %v2513_v22 = vadd.f32 %v1889_v18, %v772_v16 }
 0x10a   :  { %v1865_v23 = vpop.f32.mrf.mxu0  ;;  %v1891_v25 = vpop.f32.mrf.mxu1 }
 0x10b   :  { %v775_v24 = vadd.f32 %v1864_v20, %v727_v58  ;;  %v1892_v26 = vadd.f32 %v1891_v25, %v1890_v21  ;;  %v1180_v28 = vmul.f32 %v2513_v22, %v2513_v22 }
 0x10c   :  { %v1866_v27 = vpop.f32.mrf.mxu0  ;;  %v1893_v30 = vpop.f32.mrf.mxu1 }
 0x10d   :  { %v1867_v29 = vadd.f32 %v1866_v27, %v1865_v23  ;;  %v2517_v31 = vadd.f32 %v1892_v26, %v775_v24  ;;  %1187 = vadd.xlane.f32.xlu1 %v1180_v28 }
 0x10e   :  { %v1868_v32 = vpop.f32.mrf.mxu0  ;;  %v1894_v34 = vpop.f32.mrf.mxu1 }
 0x10f   :  { %v780_v33 = vadd.f32 %v1867_v29, %v732_v6  ;;  %v1895_v35 = vadd.f32 %v1894_v34, %v1893_v30 }
 0x110   :  { %v1869_v36 = vpop.f32.mrf.mxu0  ;;  %v1896_v37 = vpop.f32.mrf.mxu1 }
 0x111   :  { %v2519_v38 = vadd.f32 %v1895_v35, %v780_v33 }
 0x112   :  { %v1897_v39 = vpop.f32.mrf.mxu1 }
 0x122   :  { %v1937_v41 = vpop.f32.mrf.mxu0 }
 0x123   :  { %v2524_v42 = vadd.f32 %v1937_v41, %v1764_v40 }
 0x124   :  { %v955_v43 = vpop.f32.mrf.mxu0 }
 0x125   :  { %v981_v44 = vrot.slane %v2524_v42, 4  ;;  %v993_v45 = vmul.f32 %v2524_v42, %v2524_v42  ;;  %v2529_v46 = vadd.f32 %v1764_v40, %v955_v43 }
 0x126   :  { %v1938_v47 = vpop.f32.mrf.mxu0 }
 0x127   :  { %v982_v48 = vadd.f32 %v981_v44, %v2524_v42  ;;  %v1006_v49 = vrot.slane %v993_v45, 4  ;;  %v969_v50 = vrot.slane %v2529_v46, 4  ;;  %v991_v51 = vmul.f32 %v2529_v46, %v2529_v46 }
 0x128   :  { %v958_v52 = vpop.f32.mrf.mxu0 }
 0x129   :  { %v983_v53 = vrot.slane %v982_v48, 2  ;;  %v1007_v54 = vadd.f32 %v1006_v49, %v993_v45  ;;  %v970_v55 = vadd.f32 %v969_v50, %v2529_v46  ;;  %v994_v56 = vrot.slane %v991_v51, 4  ;;  %v1775_v50 = vld [vmem:[%s2815_s7] ss:$0 sm:$0xff]  ;;  %s2161_s7 = smov 114  }
 0x12a   :  { %v2536_v57 = vadd.f32 %v1764_v40, %v958_v52 }
 0x12b   :  { %v984_v58 = vadd.f32 %v983_v53, %v982_v48  ;;  %v1008_v59 = vrot.slane %v1007_v54, 2  ;;  %v971_v60 = vrot.slane %v970_v55, 2  ;;  %v995_v61 = vadd.f32 %v994_v56, %v991_v51  ;;  %v1776_v56 = vld [vmem:[%s2816_s8] ss:$0 sm:$0xff] }
 0x12c   :  { %v975_v62 = vrot.slane %v2536_v57, 4  ;;  %v992_v63 = vmul.f32 %v2536_v57, %v2536_v57 }
 0x12d   :  { %v985_v0 = vrot.slane %v984_v58, 1  ;;  %v1009_v1 = vadd.f32 %v1008_v59, %v1007_v54  ;;  %v972_v2 = vadd.f32 %v971_v60, %v970_v55  ;;  %v996_v3 = vrot.slane %v995_v61, 2 }
 0x12e   :  { %v976_v4 = vadd.f32 %v975_v62, %v2536_v57  ;;  %v1000_v5 = vrot.slane %v992_v63, 4 }
 0x12f   :  { %v986_v6 = vadd.f32 %v985_v0, %v984_v58  ;;  %v1010_v7 = vrot.slane %v1009_v1, 1  ;;  %v973_v8 = vrot.slane %v972_v2, 1  ;;  %v997_v9 = vadd.f32 %v996_v3, %v995_v61 }
 0x130   :  { %v977_v10 = vrot.slane %v976_v4, 2  ;;  %v1001_v11 = vadd.f32 %v1000_v5, %v992_v63 }
 0x131   :  { %v990_v12 = vmul.f32 0.125, %v986_v6  ;;  %v1011_v13 = vadd.f32 %v1010_v7, %v1009_v1  ;;  %v974_v14 = vadd.f32 %v973_v8, %v972_v2  ;;  %v998_v15 = vrot.slane %v997_v9, 1 }
 0x132   :  { %v978_v16 = vadd.f32 %v977_v10, %v976_v4  ;;  %v1002_v17 = vrot.slane %v1001_v11, 2 }
 0x133   :  { %v1014_v18 = vmul.f32 0.125, %v1011_v13  ;;  %v1017_v19 = vmul.f32 %v990_v12, %v990_v12  ;;  %v988_v20 = vmul.f32 0.125, %v974_v14  ;;  %v999_v21 = vadd.f32 %v998_v15, %v997_v9 }
 0x134   :  { %v979_v23 = vrot.slane %v978_v16, 1  ;;  %v1003_v24 = vadd.f32 %v1002_v17, %v1001_v11  ;;  %v1026_v45 = vsub.f32 %v2524_v42, %v990_v12  ;;  %v2557_v11 = vld [vmem:[%s2818_s3] sm:$0xff]  ;;  %v1182_v13 = vmul.f32 %v2519_v38, %v2519_v38 }
 0x135   :  { %v1020_v25 = vsub.f32 %v1014_v18, %v1017_v19  ;;  %v1015_v26 = vmul.f32 %v988_v20, %v988_v20  ;;  %v1012_v27 = vmul.f32 0.125, %v999_v21  ;;  %v1024_v49 = vsub.f32 %v2529_v46, %v988_v20 }
 0x136   :  { %v980_v28 = vadd.f32 %v979_v23, %v978_v16  ;;  %v1004_v29 = vrot.slane %v1003_v24, 1  ;;  %v2563_v14 = vmul.f32 %v2557_v11, %v2517_v31  ;;  %v1181_v17 = vmul.f32 %v2517_v31, %v2517_v31 }
 0x137   :  { %v1023_v30 = vmax.f32 %v1020_v25, 0.0  ;;  %v1018_v32 = vsub.f32 %v1012_v27, %v1015_v26  ;;  %v2571_v18 = vmul.f32 %v2557_v11, %v2513_v22  ;;  %v2577_v20 = vmul.f32 %v2557_v11, %v2519_v38 }
 0x138   :  { %v989_v33 = vmul.f32 0.125, %v980_v28  ;;  %v1005_v34 = vadd.f32 %v1004_v29, %v1003_v24  ;;  %v1184_v16 = vmul.f32 %v2563_v14, %v2563_v14 }
 0x139   :  { %v1029_v35 = vadd.f32 0.001, %v1023_v30  ;;  %v1021_v36 = vmax.f32 %v1018_v32, 0.0  ;;  %v1183_v19 = vmul.f32 %v2571_v18, %v2571_v18  ;;  %v1185_v21 = vmul.f32 %v2577_v20, %v2577_v20 }
 0x13a   :  { %v1013_v37 = vmul.f32 0.125, %v1005_v34  ;;  %v1016_v39 = vmul.f32 %v989_v33, %v989_v33  ;;  %v1025_v54 = vsub.f32 %v2536_v57, %v989_v33  ;;  %v1777_v57 = vld [vmem:[%s2817_s10] ss:$0 sm:$0xff] }
 0x13b   :  { %2072 = vrsqrt.f32 %v1029_v35  ;;  %v1027_v40 = vadd.f32 0.001, %v1021_v36 }
 0x13c   :  { %v1019_v41 = vsub.f32 %v1013_v37, %v1016_v39 }
 0x13d   :  { %2074 = vrsqrt.f32 %v1027_v40 }
 0x13e   :  { %v1022_v43 = vmax.f32 %v1019_v41, 0.0 }
 0x140   :  { %v1028_v44 = vadd.f32 0.001, %v1022_v43 }
 0x142   :  { %2076 = vrsqrt.f32 %v1028_v44 }
 0x148   :  { %v2073_v47 = vpop.eup %2072 }
 0x149   :  { %v1035_v48 = vmul.f32 %v2073_v47, %v1026_v45 }
 0x14a   :  { %v2075_v51 = vpop.eup %2074 }
 0x14b   :  { %v1033_v52 = vmul.f32 %v2075_v51, %v1024_v49  ;;  %v1045_v53 = vmul.f32 %v1775_v50, %v1035_v48 }
 0x14d   :  { %v1043_v55 = vmul.f32 %v1775_v50, %v1033_v52  ;;  %v1055_v59 = vadd.f32 %v1776_v56, %v1045_v53 }
 0x14f   :  { %v2077_v58 = vpop.eup %2076  ;;  %v1053_v61 = vadd.f32 %v1776_v56, %v1043_v55  ;;  %v1058_v62 = vmax.f32 %v1055_v59, 0.0 }
 0x150   :  { %v1034_v42 = vmul.f32 %v2077_v58, %v1025_v54 }
 0x151   :  { %v1056_v63 = vmax.f32 %v1053_v61, 0.0  ;;  %v1060_v2 = vpack.c.bf16 %v1058_v62, %v1058_v62 }
 0x152   :  { %v1044_v60 = vmul.f32 %v1775_v50, %v1034_v42 }
 0x154   :  { %v1054_v46 = vadd.f32 %v1776_v56, %v1044_v60 }
 0x156   :  { %v1057_v0 = vmax.f32 %v1054_v46, 0.0 }
 0x158   :  { %v1059_v1 = vpack.c.bf16 %v1057_v0, %v1056_v63 }
 0x15a   :  { %1955 = vmatprep.mubr.bf16.mxu1 %v1059_v1 }
 0x15b   :  { %1956 = vmatmul.mubr.bf16.vlgmr.msra.gmra.mxu1 %v1060_v2 }
 0x196   :  { %v1188_v23 = vpop.xlane.xlu1 %1187 }
 0x197   :  { %v1201_v24 = vadd.f32 1e-20, %v1188_v23 }
 0x21b   :  { %v1957_v3 = vpop.f32.mrf.mxu1 }
 0x21c   :  { %v1175_v4 = vadd.f32 %v1957_v3, %v1777_v57 }
 0x21d   :  { %v1166_v5 = vpop.f32.mrf.mxu1 }
 0x21e   :  { %v1167_v6 = vadd.f32 %v1777_v57, %v1166_v5  ;;  %v1221_v7 = vmul.f32 %v1175_v4, %v1175_v4 }
 0x21f   :  { %v1958_v8 = vpop.f32.mrf.mxu1 }
 0x220   :  { %1226 = vadd.xlane.f32.xlu1 %v1221_v7  ;;  %v1219_v9 = vmul.f32 %v1167_v6, %v1167_v6 }
 0x221   :  { %v1169_v10 = vpop.f32.mrf.mxu1 }
 0x222   :  { %v1170_v12 = vadd.f32 %v1777_v57, %v1169_v10  ;;  %1222 = vadd.xlane.f32.xlu0 %v1219_v9 }
 0x224   :  { %1191 = vadd.xlane.f32.xlu1 %v1182_v13  ;;  %v1220_v15 = vmul.f32 %v1170_v12, %v1170_v12 }
 0x226   :  { %1224 = vadd.xlane.f32.xlu0 %v1220_v15 }
 0x228   :  { %1195 = vadd.xlane.f32.xlu1 %v1184_v16 }
 0x22a   :  { %1189 = vadd.xlane.f32.xlu0 %v1181_v17 }
 0x22e   :  { %1193 = vadd.xlane.f32.xlu0 %v1183_v19 }
 0x232   :  { %1197 = vadd.xlane.f32.xlu0 %v1185_v21 }
 0x2a9   :  { %v1227_v25 = vpop.xlane.xlu1 %1226 }
 0x2aa   :  { %v1230_v26 = vadd.f32 1e-20, %v1227_v25 }
 0x2ab   :  { %v1223_v27 = vpop.xlane.xlu0 %1222 }
 0x2ac   :  { %2078 = vrsqrt.f32 %v1230_v26  ;;  %v1228_v28 = vadd.f32 1e-20, %v1223_v27 }
 0x2ad   :  { %2080 = vrsqrt.f32 %v1201_v24  ;;  %v1192_v29 = vpop.xlane.xlu1 %1191 }
 0x2ae   :  { %2082 = vrsqrt.f32 %v1228_v28  ;;  %v1203_v30 = vadd.f32 1e-20, %v1192_v29 }
 0x2af   :  { %v1225_v32 = vpop.xlane.xlu0 %1224 }
 0x2b0   :  { %2084 = vrsqrt.f32 %v1203_v30  ;;  %v1229_v33 = vadd.f32 1e-20, %v1225_v32 }
 0x2b1   :  { %v2583_v40 = vpop.xlane.xlu1 %1195 }
 0x2b2   :  { %2086 = vrsqrt.f32 %v1229_v33  ;;  %v1205_v48 = vadd.f32 1e-20, %v2583_v40 }
 0x2b3   :  { %v1190_v34 = vpop.xlane.xlu0 %1189 }
 0x2b4   :  { %v1202_v35 = vadd.f32 1e-20, %v1190_v34 }
 0x2b6   :  { %2088 = vrsqrt.f32 %v1202_v35 }
 0x2b7   :  { %v2581_v37 = vpop.xlane.xlu0 %1193 }
 0x2b8   :  { %v1204_v43 = vadd.f32 1e-20, %v2581_v37 }
 0x2b9   :  { %v2079_v36 = vpop.eup %2078 }
 0x2ba   :  { %v2081_v39 = vpop.eup %2080  ;;  %v1236_v45 = vmul.f32 %v2079_v36, %v1175_v4  ;;  %2090 = vrsqrt.f32 %v1204_v43  ;;  %v1186_v43 = vand.u32 2147483647, %v2557_v11  ;;  %v2621_v11 = vld [vmem:[%s2819_s11] sm:$0xff] }
 0x2bb   :  { %v2083_v41 = vpop.eup %2082  ;;  %v2591_v51 = vmul.f32 %v2081_v39, %v2513_v22  ;;  %v2593_v53 = vpop.xlane.xlu0 %1197  ;;  %2092 = vrsqrt.f32 %v1205_v48 }
 0x2bc   :  { %v1234_v44 = vmul.f32 %v2083_v41, %v1167_v6  ;;  %v1206_v58 = vadd.f32 1e-20, %v2593_v53 }
 0x2bd   :  { %v2085_v47 = vpop.eup %2084  ;;  %v1258_v19 = vsub.f32 %v2591_v51, %v1236_v45 }
 0x2be   :  { %v1249_v49 = vsub.f32 %v1234_v44, %v1236_v45  ;;  %v2588_v50 = vmul.f32 %v2085_v47, %v2519_v38  ;;  %v1250_v56 = vsub.f32 %v2591_v51, %v1234_v44  ;;  %2094 = vrsqrt.f32 %v1206_v58  ;;  %v2633_v58 = vld [vmem:[%s2819_s11 + $0x10] sm:$0xff] }
 0x2bf   :  { %v2087_v52 = vpop.eup %2086  ;;  %v1275_v29 = vadd.f32 1e-06, %v1258_v19 }
 0x2c0   :  { %v1266_v54 = vadd.f32 1e-06, %v1249_v49  ;;  %v1256_v55 = vsub.f32 %v2588_v50, %v1236_v45  ;;  %v1235_v60 = vmul.f32 %v2087_v52, %v1170_v12  ;;  %v1267_v22 = vadd.f32 1e-06, %v1250_v56 }
 0x2c1   :  { %v1252_v62 = vsub.f32 %v2588_v50, %v1234_v44  ;;  %v1292_v35 = vmul.f32 %v1275_v29, %v1275_v29 }
 0x2c2   :  { %v1283_v42 = vmul.f32 %v1266_v54, %v1266_v54  ;;  %v1273_v59 = vadd.f32 1e-06, %v1256_v55  ;;  %v1247_v0 = vsub.f32 %v1236_v45, %v1235_v60  ;;  %v1284_v1 = vmul.f32 %v1267_v22, %v1267_v22 }
 0x2c3   :  { %v2089_v38 = vpop.eup %2088  ;;  %v1269_v57 = vadd.f32 1e-06, %v1252_v62  ;;  %v1248_v3 = vsub.f32 %v1234_v44, %v1235_v60  ;;  %v1254_v8 = vsub.f32 %v2591_v51, %v1235_v60  ;;  %v1255_v15 = vsub.f32 %v2588_v50, %v1235_v60 }
 0x2c4   :  { %1307 = vadd.xlane.f32.xlu1 %v1283_v42  ;;  %v1290_v61 = vmul.f32 %v1273_v59, %v1273_v59  ;;  %v2599_v46 = vmul.f32 %v2089_v38, %v2517_v31  ;;  %v1264_v5 = vadd.f32 1e-06, %v1247_v0 }
 0x2c5   :  { %v1286_v7 = vmul.f32 %v1269_v57, %v1269_v57  ;;  %v1265_v31 = vadd.f32 1e-06, %v1248_v3  ;;  %v1271_v17 = vadd.f32 1e-06, %v1254_v8  ;;  %v1272_v24 = vadd.f32 1e-06, %v1255_v15 }
 0x2c6   :  { %1321 = vadd.xlane.f32.xlu0 %v1290_v61  ;;  %v1251_v63 = vsub.f32 %v2599_v46, %v1234_v44  ;;  %v1253_v6 = vsub.f32 %v2599_v46, %v1235_v60  ;;  %v1281_v12 = vmul.f32 %v1264_v5, %v1264_v5  ;;  %v1257_v25 = vsub.f32 %v2599_v46, %v1236_v45 }
 0x2c7   :  { %v2091_v9 = vpop.eup %2090  ;;  %v1282_v16 = vmul.f32 %v1265_v31, %v1265_v31  ;;  %v1288_v28 = vmul.f32 %v1271_v17, %v1271_v17  ;;  %v1289_v32 = vmul.f32 %v1272_v24, %v1272_v24  ;;  %v1244_v36 = vsub.f32 %v2599_v46, %v2588_v50 }
 0x2c8   :  { %v1268_v2 = vadd.f32 1e-06, %v1251_v63  ;;  %v2093_v10 = vpop.eup %2092  ;;  %v1270_v13 = vadd.f32 1e-06, %v1253_v6  ;;  %v1216_v21 = vmul.f32 %v2091_v9, %v2571_v18  ;;  %v1274_v33 = vadd.f32 1e-06, %v1257_v25 }
 0x2c9   :  { %v1217_v26 = vmul.f32 %v2093_v10, %v2563_v14  ;;  %v1261_v44 = vadd.f32 1e-06, %v1244_v36  ;;  %v1246_v45 = vsub.f32 %v2591_v51, %v2588_v50  ;;  %v2626_v50 = vld [vmem:[%s2819_s11 + $0x8] sm:$0xff]  ;;  %s2141_s11 = smov 11  }
 0x2ca   :  { %1309 = vadd.xlane.f32.xlu0 %v1284_v1  ;;  %v1285_v4 = vmul.f32 %v1268_v2, %v1268_v2  ;;  %v1287_v23 = vmul.f32 %v1270_v13, %v1270_v13  ;;  %v1291_v39 = vmul.f32 %v1274_v33, %v1274_v33 }
 0x2cb   :  { %v2095_v27 = vpop.eup %2094  ;;  %v1242_v30 = vsub.f32 %v1216_v21, %v1217_v26  ;;  %v1278_v48 = vmul.f32 %v1261_v44, %v1261_v44  ;;  %v1263_v49 = vadd.f32 1e-06, %v1246_v45 }
 0x2cc   :  { %1311 = vadd.xlane.f32.xlu1 %v1285_v4  ;;  %v1218_v34 = vmul.f32 %v2095_v27, %v2577_v20  ;;  %v1245_v20 = vsub.f32 %v2591_v51, %v2599_v46  ;;  %v1240_v51 = vmul.f32 %v2626_v50, %v2621_v11 }
 0x2cd   :  { %v1259_v18 = vadd.f32 1e-06, %v1242_v30  ;;  %v1280_v55 = vmul.f32 %v1263_v49, %v1263_v49 }
 0x2ce   :  { %1313 = vadd.xlane.f32.xlu0 %v1286_v7  ;;  %v1243_v41 = vsub.f32 %v1216_v21, %v1218_v34  ;;  %v1262_v54 = vadd.f32 1e-06, %v1245_v20  ;;  %v2636_v42 = vmul.f32 %v1240_v51, %v2633_v58 }
 0x2cf   :  { %v1276_v14 = vmul.f32 %v1259_v18, %v1259_v18 }
 0x2d0   :  { %1303 = vadd.xlane.f32.xlu1 %v1281_v12  ;;  %v1260_v47 = vadd.f32 1e-06, %v1243_v41  ;;  %v1279_v56 = vmul.f32 %v1262_v54, %v1262_v54 }
 0x2d2   :  { %1305 = vadd.xlane.f32.xlu0 %v1282_v16  ;;  %v1277_v52 = vmul.f32 %v1260_v47, %v1260_v47 }
 0x2d4   :  { %1315 = vadd.xlane.f32.xlu1 %v1287_v23 }
 0x2d6   :  { %1317 = vadd.xlane.f32.xlu0 %v1288_v28 }
 0x2d8   :  { %1319 = vadd.xlane.f32.xlu1 %v1289_v32 }
 0x2da   :  { %1325 = vadd.xlane.f32.xlu0 %v1292_v35 }
 0x2dc   :  { %1323 = vadd.xlane.f32.xlu1 %v1291_v39 }
 0x2de   :  { %1293 = vadd.xlane.f32.xlu0 %v1276_v14 }
 0x2e0   :  { %1199 = vadd.xlane.f32.xlu1 %v1186_v43 }
 0x2e2   :  { %1297 = vadd.xlane.f32.xlu0 %v1278_v48 }
 0x2e4   :  { %1295 = vadd.xlane.f32.xlu1 %v1277_v52 }
 0x2e6   :  { %1301 = vadd.xlane.f32.xlu0 %v1280_v55 }
 0x2e8   :  { %1299 = vadd.xlane.f32.xlu1 %v1279_v56 }
 0x2f9   :  { %1534 = vrot.lane.b32.xlu1 %v2636_v42, %s2140_s14 }
 0x34d   :  { %v2641_v60 = vpop.xlane.xlu1 %1307 }
 0x34e   :  { %2096 = vrsqrt.f32 %v2641_v60  ;;  %vm1378_vm0 = vcmp.eq.f32.partialorder %v2641_v60, inf  ;;  %v1381_v6 = vand.u32 2147483648, %v2641_v60  ;;  %vm1380_vm1 = vcmp.eq.f32.partialorder %v2641_v60, 0.0 }
 0x34f   :  { %v2639_v59 = vpop.xlane.xlu0 %1321 }
 0x350   :  { %2098 = vrsqrt.f32 %v2639_v59  ;;  %vm1427_vm2 = vcmp.eq.f32.partialorder %v2639_v59, inf  ;;  %v1430_v9 = vand.u32 2147483648, %v2639_v59  ;;  %vm1429_vm4 = vcmp.eq.f32.partialorder %v2639_v59, 0.0 }
 0x353   :  { %v2643_v38 = vpop.xlane.xlu0 %1309 }
 0x354   :  { %vm1385_vm3 = vcmp.eq.f32.partialorder %v2643_v38, inf  ;;  %v1388_v12 = vand.u32 2147483648, %v2643_v38  ;;  %vm1387_vm6 = vcmp.eq.f32.partialorder %v2643_v38, 0.0 }
 0x355   :  { %v2645_v61 = vpop.xlane.xlu1 %1311 }
 0x356   :  { %2100 = vrsqrt.f32 %v2645_v61  ;;  %vm1392_vm5 = vcmp.eq.f32.partialorder %v2645_v61, inf  ;;  %v1395_v16 = vand.u32 2147483648, %v2645_v61  ;;  %vm1394_vm9 = vcmp.eq.f32.partialorder %v2645_v61, 0.0 }
 0x357   :  { %v2649_v22 = vpop.xlane.xlu0 %1313 }
 0x358   :  { %vm1399_vm7 = vcmp.eq.f32.partialorder %v2649_v22, inf  ;;  %v1402_v19 = vand.u32 2147483648, %v2649_v22  ;;  %vm1401_vm12 = vcmp.eq.f32.partialorder %v2649_v22, 0.0 }
 0x359   :  { %v1304_v46 = vpop.xlane.xlu1 %1303 }
 0x35a   :  { %2102 = vrsqrt.f32 %v1304_v46  ;;  %vm1364_vm8 = vcmp.eq.f32.partialorder %v1304_v46, inf  ;;  %v1367_v27 = vand.u32 2147483648, %v1304_v46  ;;  %vm1366_vm11 = vcmp.eq.f32.partialorder %v1304_v46, 0.0 }
 0x35b   :  { %2104 = vrsqrt.f32 %v2643_v38  ;;  %v2653_v62 = vpop.xlane.xlu0 %1305  ;;  %v2097_v2 = vpop.eup %2096 }
 0x35c   :  { %2106 = vrsqrt.f32 %v2649_v22  ;;  %v1377_v31 = vmul.f32 %v2097_v2, %v2641_v60  ;;  %vm1371_vm13 = vcmp.eq.f32.partialorder %v2653_v62, inf }
 0x35d   :  { %v2656_v63 = vpop.xlane.xlu1 %1315  ;;  %v2099_v3 = vpop.eup %2098 }
 0x35e   :  { %2108 = vrsqrt.f32 %v2656_v63  ;;  %v1426_v8 = vmul.f32 %v2099_v3, %v2639_v59  ;;  %v1379_v26 = vsel %vm1378_vm0, %v2641_v60, %v1377_v31  ;;  %vm1406_vm10 = vcmp.eq.f32.partialorder %v2656_v63, inf }
 0x35f   :  { %v2659_v0 = vpop.xlane.xlu0 %1317  ;;  %2110 = vrsqrt.f32 %v2653_v62  ;;  %v1409_v29 = vand.u32 2147483648, %v2656_v63  ;;  %vm1408_vm14 = vcmp.eq.f32.partialorder %v2656_v63, 0.0  ;;  %v1382_v18 = vsel %vm1380_vm1, %v1381_v6, %v1379_v26 }
 0x360   :  { %v1428_v24 = vsel %vm1427_vm2, %v2639_v59, %v1426_v8 }
 0x361   :  { %v2662_v1 = vpop.xlane.xlu1 %1319  ;;  %v1431_v34 = vsel %vm1429_vm4, %v1430_v9, %v1428_v24  ;;  %v1416_v24 = vand.u32 2147483648, %v2659_v0 }
 0x362   :  { %2112 = vrsqrt.f32 %v2662_v1  ;;  %vm1420_vm15 = vcmp.eq.f32.partialorder %v2662_v1, inf  ;;  %v1423_v39 = vand.u32 2147483648, %v2662_v1  ;;  %vm1422_vm0 = vcmp.eq.f32.partialorder %v2662_v1, 0.0 }
 0x363   :  { %v2665_v57 = vpop.xlane.xlu0 %1325  ;;  %v2101_v5 = vpop.eup %2100 }
 0x364   :  { %2114 = vrsqrt.f32 %v2665_v57  ;;  %v1391_v15 = vmul.f32 %v2101_v5, %v2645_v61  ;;  %vm1441_vm2 = vcmp.eq.f32.partialorder %v2665_v57, inf  ;;  %v1444_v43 = vand.u32 2147483648, %v2665_v57 }
 0x365   :  { %2116 = vrsqrt.f32 %v2659_v0  ;;  %v2669_v4 = vpop.xlane.xlu1 %1323  ;;  %vm1443_vm4 = vcmp.eq.f32.partialorder %v2665_v57, 0.0 }
 0x366   :  { %2118 = vrsqrt.f32 %v2669_v4  ;;  %v1393_v30 = vsel %vm1392_vm5, %v2645_v61, %v1391_v15  ;;  %vm1434_vm1 = vcmp.eq.f32.partialorder %v2669_v4, inf  ;;  %v1437_v51 = vand.u32 2147483648, %v2669_v4 }
 0x367   :  { %v2103_v7 = vpop.eup %2102  ;;  %v1396_v44 = vsel %vm1394_vm9, %v1395_v16, %v1393_v30  ;;  %vm1373_vm5 = vcmp.eq.f32.partialorder %v2653_v62, 0.0  ;;  %vm1551_vm9 = vcmask 15360  }
 0x368   :  { %v2105_v10 = vpop.eup %2104  ;;  %v1363_v13 = vmul.f32 %v2103_v7, %v1304_v46 }
 0x369   :  { %v2107_v17 = vpop.eup %2106  ;;  %v1384_v23 = vmul.f32 %v2105_v10, %v2643_v38 }
 0x36a   :  { %v1365_v25 = vsel %vm1364_vm8, %v1304_v46, %v1363_v13  ;;  %v1398_v28 = vmul.f32 %v2107_v17, %v2649_v22  ;;  %vm1549_vm8 = vcmask 7168  }
 0x36b   :  { %v2109_v21 = vpop.eup %2108  ;;  %v2708_v35 = vsel %vm1366_vm11, %v1367_v27, %v1365_v25  ;;  %v1386_v41 = vsel %vm1385_vm3, %v2643_v38, %v1384_v23  ;;  %vm1436_vm3 = vcmp.eq.f32.partialorder %v2669_v4, 0.0 }
 0x36c   :  { %v2111_v32 = vpop.eup %2110  ;;  %v1405_v33 = vmul.f32 %v2109_v21, %v2656_v63  ;;  %v1466_v47 = vsub.f32 %v2708_v35, %v1382_v18  ;;  %v1400_v20 = vsel %vm1399_vm7, %v2649_v22, %v1398_v28  ;;  %v1389_v54 = vsel %vm1387_vm6, %v1388_v12, %v1386_v41 }
 0x36d   :  { %v1370_v49 = vmul.f32 %v2111_v32, %v2653_v62  ;;  %v1471_v59 = vsub.f32 %v1389_v54, %v1396_v44  ;;  %v1403_v2 = vsel %vm1401_vm12, %v1402_v19, %v1400_v20  ;;  %vm1413_vm6 = vcmp.eq.f32.partialorder %v2659_v0, inf }
 0x36e   :  { %v1407_v55 = vsel %vm1406_vm10, %v2656_v63, %v1405_v33  ;;  %v1467_v6 = vadd.f32 0.2, %v1466_v47  ;;  %v1476_v63 = vsub.f32 %v1389_v54, %v1403_v2  ;;  %vm1415_vm7 = vcmp.eq.f32.partialorder %v2659_v0, 0.0 }
 0x36f   :  { %v2113_v36 = vpop.eup %2112  ;;  %v1410_v7 = vsel %vm1408_vm14, %v1409_v29, %v1407_v55  ;;  %v1372_v22 = vsel %vm1371_vm13, %v2653_v62, %v1370_v49  ;;  %v1472_v10 = vadd.f32 0.2, %v1471_v59  ;;  %vm1553_vm10 = vcmask 23552  }
 0x370   :  { %v1419_v14 = vmul.f32 %v2113_v36, %v2662_v1  ;;  %v1468_v15 = vmax.f32 %v1467_v6, 0.0  ;;  %v1477_v27 = vadd.f32 0.2, %v1476_v63 }
 0x371   :  { %v2115_v45 = vpop.eup %2114  ;;  %v1473_v25 = vmax.f32 %v1472_v10, 0.0 }
 0x372   :  { %v2117_v48 = vpop.eup %2116  ;;  %v1440_v52 = vmul.f32 %v2115_v45, %v2665_v57  ;;  %v1421_v60 = vsel %vm1420_vm15, %v2662_v1, %v1419_v14  ;;  %v1374_v1 = vand.u32 2147483648, %v2653_v62  ;;  %v1469_v32 = vmin.f32 %v1468_v15, 1000000.0 }
 0x373   :  { %v2119_v56 = vpop.eup %2118  ;;  %v1424_v46 = vsel %vm1422_vm0, %v1423_v39, %v1421_v60  ;;  %v1412_v3 = vmul.f32 %v2117_v48, %v2659_v0  ;;  %v1478_v36 = vmax.f32 %v1477_v27, 0.0 }
 0x374   :  { %v1433_v61 = vmul.f32 %v2119_v56, %v2669_v4  ;;  %v1442_v38 = vsel %vm1441_vm2, %v2665_v57, %v1440_v52  ;;  %v1486_v9 = vsub.f32 %v1410_v7, %v1424_v46  ;;  %v1375_v16 = vsel %vm1373_vm5, %v1374_v1, %v1372_v22  ;;  %v1200_v56 = vpop.xlane.xlu1 %1199 }
 0x375   :  { %v1445_v5 = vsel %vm1443_vm4, %v1444_v43, %v1442_v38  ;;  %v1414_v23 = vsel %vm1413_vm6, %v2659_v0, %v1412_v3  ;;  %v1461_v28 = vsub.f32 %v2708_v35, %v1375_v16  ;;  %v1470_v0 = vmul.f32 %v1469_v32, %v2636_v42 }
 0x376   :  { %v1496_v31 = vsub.f32 %v1431_v34, %v1445_v5  ;;  %v1435_v8 = vsel %vm1434_vm1, %v2669_v4, %v1433_v61  ;;  %v1487_v21 = vadd.f32 0.2, %v1486_v9  ;;  %v1417_v62 = vsel %vm1415_vm7, %v1416_v24, %v1414_v23 }
 0x377   :  { %v1438_v57 = vsel %vm1436_vm3, %v1437_v51, %v1435_v8  ;;  %v1462_v39 = vadd.f32 0.2, %v1461_v28  ;;  %v1481_v41 = vsub.f32 %v1410_v7, %v1417_v62  ;;  %v1479_v43 = vmin.f32 %v1478_v36, 1000000.0 }
 0x378   :  { %v1497_v12 = vadd.f32 0.2, %v1496_v31  ;;  %v1491_v13 = vsub.f32 %v1431_v34, %v1438_v57  ;;  %v1488_v33 = vmax.f32 %v1487_v21, 0.0  ;;  %v1474_v34 = vmin.f32 %v1473_v25, 1000000.0  ;;  %v1296_v59 = vpop.xlane.xlu1 %1295 }
 0x379   :  { %v1463_v44 = vmax.f32 %v1462_v39, 0.0  ;;  %v1482_v45 = vadd.f32 0.2, %v1481_v41  ;;  %v1480_v20 = vmul.f32 %v1479_v43, %v2621_v11  ;;  %2120 = vrsqrt.f32 %v1296_v59 }
 0x37a   :  { %v1498_v17 = vmax.f32 %v1497_v12, 0.0  ;;  %v1492_v19 = vadd.f32 0.2, %v1491_v13  ;;  %v1489_v14 = vmin.f32 %v1488_v33, 1000000.0  ;;  %v1475_v35 = vmul.f32 %v1474_v34, %v2621_v11 }
 0x37b   :  { %v1464_v48 = vmin.f32 %v1463_v44, 1000000.0  ;;  %v1483_v49 = vmax.f32 %v1482_v45, 0.0  ;;  %vm1336_vm11 = vcmp.eq.f32.partialorder %v1296_v59, inf  ;;  %v1339_v31 = vand.u32 2147483648, %v1296_v59 }
 0x37c   :  { %v1499_v4 = vmin.f32 %v1498_v17, 1000000.0  ;;  %v1493_v26 = vmax.f32 %v1492_v19, 0.0  ;;  %v1490_v47 = vmul.f32 %v1489_v14, %v2626_v50  ;;  %v1300_v61 = vpop.xlane.xlu1 %1299  ;;  %vm1338_vm15 = vcmp.eq.f32.partialorder %v1296_v59, 0.0 }
 0x37d   :  { %v1465_v52 = vmul.f32 %v1464_v48, %v2636_v42  ;;  %v1484_v54 = vmin.f32 %v1483_v49, 1000000.0  ;;  %2122 = vrsqrt.f32 %v1300_v61  ;;  %vm1350_vm12 = vcmp.eq.f32.partialorder %v1300_v61, inf }
 0x37e   :  { %v1500_v29 = vmul.f32 %v1499_v4, %v2633_v58  ;;  %v1494_v30 = vmin.f32 %v1493_v26, 1000000.0  ;;  %v1353_v1 = vand.u32 2147483648, %v1300_v61  ;;  %vm1352_vm0 = vcmp.eq.f32.partialorder %v1300_v61, 0.0 }
 0x37f   :  { %v1485_v55 = vmul.f32 %v1484_v54, %v2626_v50  ;;  %v2153_v41 = vmov 0.0   ;;  %vm1555_vm6 = vcmask 31744   ;;  %vm1557_vm7 = vcmask 39936  }
 0x380   :  { %1530 = vrot.lane.b32.xlu0 %v1500_v29, %s2141_s11  ;;  %v1495_v18 = vmul.f32 %v1494_v30, %v2633_v58  ;;  %v1535_v24 = vpop.permute.xlu1 %1534 }
 0x382   :  { %1526 = vrot.lane.b32.xlu1 %v1495_v18, %s2142_s4 }
 0x384   :  { %1506 = vrot.lane.b32.xlu0 %v1470_v0, %s2143_s15 }
 0x386   :  { %1510 = vrot.lane.b32.xlu1 %v1475_v35, %s2144_s16  ;;  %v2121_v38 = vpop.eup %2120 }
 0x387   :  { %v1335_v2 = vmul.f32 %v2121_v38, %v1296_v59 }
 0x388   :  { %1522 = vrot.lane.b32.xlu0 %v1490_v47, %s2145_s17 }
 0x389   :  { %v1337_v7 = vsel %vm1336_vm11, %v1296_v59, %v1335_v2  ;;  %vm1559_vm11 = vcmask 48128  }
 0x38a   :  { %1514 = vrot.lane.b32.xlu1 %v1480_v20, %s2146_s0  ;;  %v2123_v46 = vpop.eup %2122  ;;  %v1340_v12 = vsel %vm1338_vm15, %v1339_v31, %v1337_v7  ;;  %vm1569_vm15 = vcmask 89088  }
 0x38c   :  { %1538 = vrot.lane.b32.xlu0 %v2621_v11, %s2147_s18  ;;  %v1579_v11 = vsel %vm1549_vm8, %v2581_v37, %v2583_v40 }
 0x38d   :  { %v1580_v42 = vsel %vm1551_vm9, %v1579_v11, %v2593_v53  ;;  %v1349_v53 = vmul.f32 %v2123_v46, %v1300_v61 }
 0x38e   :  { %1502 = vrot.lane.b32.xlu1 %v1465_v52, %s2148_s19  ;;  %v1581_v51 = vsel %vm1553_vm10, %v1580_v42, %v1200_v56 }
 0x38f   :  { %v1351_v8 = vsel %vm1350_vm12, %v1300_v61, %v1349_v53  ;;  %vm1561_vm12 = vcmask 56320  }
 0x390   :  { %1546 = vrot.lane.b32.xlu0 %v2633_v58, %s2149_s20  ;;  %v1294_v58 = vpop.xlane.xlu0 %1293  ;;  %v1354_v63 = vsel %vm1352_vm0, %v1353_v1, %v1351_v8  ;;  %vm1571_vm0 = vcmask 97280  }
 0x391   :  { %2124 = vrsqrt.f32 %v1294_v58  ;;  %vm1329_vm13 = vcmp.eq.f32.partialorder %v1294_v58, inf  ;;  %v1332_v57 = vand.u32 2147483648, %v1294_v58  ;;  %vm1331_vm2 = vcmp.eq.f32.partialorder %v1294_v58, 0.0 }
 0x392   :  { %1518 = vrot.lane.b32.xlu1 %v1485_v55, %s2150_s21 }
 0x394   :  { %v1298_v60 = vpop.xlane.xlu0 %1297 }
 0x395   :  { %2126 = vrsqrt.f32 %v1298_v60  ;;  %vm1343_vm14 = vcmp.eq.f32.partialorder %v1298_v60, inf  ;;  %v1346_v13 = vand.u32 2147483648, %v1298_v60  ;;  %vm1345_vm1 = vcmp.eq.f32.partialorder %v1298_v60, 0.0 }
 0x396   :  { %1542 = vrot.lane.b32.xlu1 %v2626_v50, %s2151_s22 }
 0x398   :  { %v1302_v50 = vpop.xlane.xlu0 %1301 }
 0x399   :  { %2128 = vrsqrt.f32 %v1302_v50  ;;  %vm1357_vm4 = vcmp.eq.f32.partialorder %v1302_v50, inf  ;;  %v1360_v21 = vand.u32 2147483648, %v1302_v50  ;;  %vm1359_vm3 = vcmp.eq.f32.partialorder %v1302_v50, 0.0 }
 0x39a   :  { %1583 = vrot.lane.b32.xlu1 %v1581_v51, %s2152_s23 }
 0x39e   :  { %v2125_v37 = vpop.eup %2124 }
 0x39f   :  { %v1328_v3 = vmul.f32 %v2125_v37, %v1294_v58 }
 0x3a1   :  { %v1330_v9 = vsel %vm1329_vm13, %v1294_v58, %v1328_v3  ;;  %vm1563_vm13 = vcmask 64512  }
 0x3a2   :  { %v2127_v40 = vpop.eup %2126  ;;  %v1333_v15 = vsel %vm1331_vm2, %v1332_v57, %v1330_v9  ;;  %vm1573_vm2 = vcmask 105472  }
 0x3a3   :  { %v1342_v6 = vmul.f32 %v2127_v40, %v1298_v60  ;;  %v1446_v19 = vsub.f32 %v1340_v12, %v1333_v15 }
 0x3a5   :  { %v1344_v10 = vsel %vm1343_vm14, %v1298_v60, %v1342_v6  ;;  %v1450_v4 = vsub.f32 0.0, %v1446_v19  ;;  %vm1447_vm5 = vcmp.gt.f32.partialorder %v1446_v19, 0.0  ;;  %vm1565_vm14 = vcmask 72704  }
 0x3a6   :  { %v2129_v5 = vpop.eup %2128  ;;  %v1347_v17 = vsel %vm1345_vm1, %v1346_v13, %v1344_v10  ;;  %v1786_v0 = vsel %vm1447_vm5, 1.0, %v2153_v41  ;;  %vm1575_vm1 = vcmask 113664   ;;  %vm1588_vm5 = vcmask 162816  }
 0x3a7   :  { %v1356_v22 = vmul.f32 %v2129_v5, %v1302_v50  ;;  %v1453_v23 = vsub.f32 %v1347_v17, %v1354_v63  ;;  %v1451_v29 = vadd.f32 0.2, %v1450_v4 }
 0x3a9   :  { %v1358_v16 = vsel %vm1357_vm4, %v1302_v50, %v1356_v22  ;;  %v1454_v26 = vsub.f32 0.0, %v1453_v23  ;;  %v1452_v34 = vmax.f32 %v1451_v29, 0.0  ;;  %vm1577_vm4 = vcmask 121856  }
 0x3aa   :  { %v1361_v25 = vsel %vm1359_vm3, %v1360_v21, %v1358_v16  ;;  %vm1586_vm3 = vcmask 130048  }
 0x3ab   :  { %v1457_v27 = vsub.f32 %v1347_v17, %v1361_v25  ;;  %v1455_v30 = vadd.f32 0.2, %v1454_v26  ;;  %v1550_v35 = vsel %vm1549_vm8, %v1786_v0, %v1452_v34  ;;  %vm1567_vm8 = vcmask 80896  }
 0x3ad   :  { %v1458_v32 = vsub.f32 0.0, %v1457_v27  ;;  %v1456_v36 = vmax.f32 %v1455_v30, 0.0 }
 0x3af   :  { %v1459_v39 = vadd.f32 0.2, %v1458_v32  ;;  %v1552_v43 = vsel %vm1551_vm9, %v1550_v35, %v1456_v36 }
 0x3b1   :  { %v1460_v44 = vmax.f32 %v1459_v39, 0.0 }
 0x3b3   :  { %v1554_v20 = vsel %vm1553_vm10, %v1552_v43, %v1460_v44 }
 0x3f2   :  { %v1531_v28 = vpop.permute.xlu0 %1530 }
 0x3f4   :  { %v1527_v62 = vpop.permute.xlu1 %1526 }
 0x3f6   :  { %v1507_v18 = vpop.permute.xlu0 %1506 }
 0x3f8   :  { %v1511_v33 = vpop.permute.xlu1 %1510 }
 0x3fa   :  { %v1523_v45 = vpop.permute.xlu0 %1522 }
 0x3fc   :  { %v1515_v14 = vpop.permute.xlu1 %1514 }
 0x3fe   :  { %v1539_v54 = vpop.permute.xlu0 %1538 }
 0x400   :  { %v1503_v47 = vpop.permute.xlu1 %1502 }
 0x401   :  { %v1556_v48 = vsel %vm1555_vm6, %v1554_v20, %v1503_v47 }
 0x402   :  { %v1558_v49 = vsel %vm1557_vm7, %v1556_v48, %v1507_v18  ;;  %v1547_v61 = vpop.permute.xlu0 %1546 }
 0x403   :  { %v1560_v52 = vsel %vm1559_vm11, %v1558_v49, %v1511_v33 }
 0x404   :  { %v1519_v55 = vpop.permute.xlu1 %1518  ;;  %v1562_v56 = vsel %vm1561_vm12, %v1560_v52, %v1515_v14 }
 0x405   :  { %v1564_v11 = vsel %vm1563_vm13, %v1562_v56, %v1519_v55 }
 0x406   :  { %v1566_v42 = vsel %vm1565_vm14, %v1564_v11, %v1523_v45 }
 0x407   :  { %v1568_v51 = vsel %vm1567_vm8, %v1566_v42, %v1527_v62 }
 0x408   :  { %v1570_v58 = vsel %vm1569_vm15, %v1568_v51, %v1531_v28  ;;  %v1543_v59 = vpop.permute.xlu1 %1542 }
 0x409   :  { %v1572_v60 = vsel %vm1571_vm0, %v1570_v58, %v1535_v24 }
 0x40a   :  { %v1574_v50 = vsel %vm1573_vm2, %v1572_v60, %v1539_v54 }
 0x40b   :  { %v1576_v38 = vsel %vm1575_vm1, %v1574_v50, %v1543_v59 }
 0x40c   :  { %v1578_v46 = vsel %vm1577_vm4, %v1576_v38, %v1547_v61  ;;  %v1584_v37 = vpop.permute.xlu1 %1583 }
 0x40d   :  { %v1587_v40 = vsel %vm1586_vm3, %v1578_v46, %v1584_v37 }
 0x40e   :  { %v1589_v2 = vsel %vm1588_vm5, %v1587_v40, 0.0 }
 0x40f   :  { %v1590_v53 = vrot.slane %v1589_v2, 4 }
 0x411   :  { %v1591_v3 = vadd.f32 %v1590_v53, %v1589_v2 }
 0x413   :  { %v1592_v5 = vrot.slane %v1591_v3, 2 }
 0x415   :  { %v1593_v6 = vadd.f32 %v1592_v5, %v1591_v3 }
 0x417   :  { %v1594_v7 = vrot.slane %v1593_v6, 1 }
 0x419   :  { %v1595_v31 = vadd.f32 %v1594_v7, %v1593_v6 }
 0x41b   :  { %v1603_v8 = vmax.f32 %v1595_v31, 1.0  ;;  %2130 = vrsqrt.f32 %v1595_v31  ;;  %vm1640_vm13 = vcmp.eq.f32.partialorder %v1595_v31, inf  ;;  %v1643_v57 = vand.u32 2147483648, %v1595_v31 }
 0x41c   :  { %vm1642_vm14 = vcmp.eq.f32.partialorder %v1595_v31, 0.0  ;;  %v1596_v17 = vmul.f32 0.125, %v1595_v31 }
 0x41d   :  { %v1604_v9 = vmul.f32 2.0, %v1603_v8 }
 0x41f   :  { %1621 = vrot.lane.b32.xlu1 %v1604_v9, %s2154_s24  ;;  %1616 = vrot.lane.b32.xlu0 %v1604_v9, %s2155_s2 }
 0x423   :  { %1611 = vrot.lane.b32.xlu1 %v1604_v9, %s2156_s9  ;;  %1598 = vrot.lane.b32.xlu0 %v1595_v31, %s2157_s6 }
 0x427   :  { %1606 = vrot.lane.b32.xlu0 %v1604_v9, %s2158_s25 }
 0x428   :  { %v2131_v22 = vpop.eup %2130 }
 0x429   :  { %v1639_v1 = vmul.f32 %v2131_v22, %v1595_v31 }
 0x42b   :  { %v1641_v10 = vsel %vm1640_vm13, %v1595_v31, %v1639_v1 }
 0x42c   :  { %v1644_v12 = vsel %vm1642_vm14, %v1643_v57, %v1641_v10 }
 0x42d   :  { %1646 = vrot.lane.b32.xlu0 %v1644_v12, %s2157_s6 }
 0x431   :  { %1650 = vrot.lane.b32.xlu0 %v1644_v12, %s2159_s26 }
 0x491   :  { %v1617_v13 = vpop.permute.xlu0 %1616  ;;  %v1622_v63 = vpop.permute.xlu1 %1621 }
 0x492   :  { %2132 = vrcp.f32 %v1617_v13 }
 0x493   :  { %2134 = vrcp.f32 %v1622_v63 }
 0x495   :  { %v1599_v15 = vpop.permute.xlu0 %1598  ;;  %v1612_v62 = vpop.permute.xlu1 %1611 }
 0x496   :  { %v1601_v16 = vadd.f32 %v1599_v15, %v1595_v31 }
 0x498   :  { %v1602_v19 = vmul.f32 0.0625, %v1601_v16 }
 0x499   :  { %v1607_v21 = vpop.permute.xlu0 %1606 }
 0x49a   :  { %2136 = vrcp.f32 %v1607_v21  ;;  %v1672_v23 = vsel %vm1551_vm9, %v1596_v17, %v1602_v19 }
 0x49b   :  { %2138 = vrcp.f32 %v1612_v62 }
 0x49f   :  { %v2133_v24 = vpop.eup %2132  ;;  %v1647_v29 = vpop.permute.xlu0 %1646 }
 0x4a0   :  { %v1620_v25 = vmul.f32 %v2133_v24, %v1601_v16  ;;  %v2135_v4 = vpop.eup %2134  ;;  %v1649_v34 = vadd.f32 %v1647_v29, %v1644_v12 }
 0x4a1   :  { %v1625_v26 = vmul.f32 %v2135_v4, %v1601_v16 }
 0x4a2   :  { %1627 = vrot.lane.b32.xlu1 %v1620_v25, %s2159_s26 }
 0x4a3   :  { %v1651_v32 = vpop.permute.xlu0 %1650 }
 0x4a4   :  { %v1653_v36 = vadd.f32 %v1651_v32, %v1649_v34 }
 0x4a6   :  { %1632 = vrot.lane.b32.xlu1 %v1625_v26, %s2160_s27  ;;  %v1654_v14 = vmul.f32 0.33333334, %v1653_v36 }
 0x4a7   :  { %v2137_v27 = vpop.eup %2136 }
 0x4a8   :  { %v1610_v28 = vmul.f32 %v2137_v27, %v1601_v16  ;;  %v2139_v30 = vpop.eup %2138  ;;  %v1655_v43 = vmul.f32 0.35355338, %v1654_v14 }
 0x4a9   :  { %v1615_v18 = vmul.f32 %v2139_v30, %v1601_v16 }
 0x4aa   :  { %1657 = vrot.lane.b32.xlu1 %v1610_v28, %s2157_s6 }
 0x4ae   :  { %1665 = vrot.lane.b32.xlu1 %v1596_v17, %s2161_s7 }
 0x514   :  { %v1628_v33 = vpop.permute.xlu1 %1627 }
 0x515   :  { %v1630_v39 = vadd.f32 %v1628_v33, %v1615_v18 }
 0x518   :  { %v1633_v41 = vpop.permute.xlu1 %1632 }
 0x519   :  { %v1635_v0 = vadd.f32 %v1633_v41, %v1630_v39 }
 0x51b   :  { %v1637_v35 = vmul.f32 0.33333334, %v1635_v0 }
 0x51c   :  { %v1658_v44 = vpop.permute.xlu1 %1657 }
 0x51d   :  { %1661 = vrot.lane.b32.xlu0 %v1637_v35, %s2159_s26  ;;  %v1673_v45 = vsel %vm1553_vm10, %v1672_v23, %v1658_v44 }
 0x520   :  { %v1666_v48 = vpop.permute.xlu1 %1665 }
 0x521   :  { %1669 = vrot.lane.b32.xlu0 %v1655_v43, %s2162_s1 }
 0x58f   :  { %v1662_v47 = vpop.permute.xlu0 %1661 }
 0x590   :  { %v1674_v20 = vsel %vm1555_vm6, %v1673_v45, %v1662_v47 }
 0x591   :  { %v1675_v52 = vsel %vm1557_vm7, %v1674_v20, %v1666_v48 }
 0x593   :  { %v1670_v49 = vpop.permute.xlu0 %1669 }
 0x594   :  { %v1676_v54 = vsel %vm1559_vm11, %v1675_v52, %v1670_v49 }
 0x595   :  { %v1677_v55 = vsel %vm1561_vm12, %v1676_v54, 0.0 }
 0x596   :  { %1678 = vst [vmem:[%s2820_s12] sm:$0x1] %v1677_v55 }

</bundles_post_ra>
